<compile_context>
chip_gen: v7x
topology: tpu7x:2x2x1
jax: 0.10.0
libtpu: 0.0.40
codegen_flags: <defaults>
</compile_context>

<pallas_src>
import functools

import jax
import jax.numpy as jnp
from jax import lax
from jax.experimental import pallas as pl
from jax.experimental.pallas import tpu as pltpu


# --------------------------------------------------------------------------
# Pallas kernel
# --------------------------------------------------------------------------
def _bilstm_fc_kernel(x_ref,        # (T, TB, C)   time-major input block
                      wih_ref,      # (C, 8H)      packed input->gate weights (both dirs)
                      bias_ref,     # (1, 8H)      packed fused bias (b_ih + b_hh, both dirs)
                      whh_ref,      # (2H, 8H)     packed block-diagonal recurrent weights
                      fcw_f_ref,    # (H, O)       fc weight rows for forward hidden
                      fcw_b_ref,    # (H, O)       fc weight rows for backward hidden
                      fcb_ref,      # (1, O)       fc bias
                      out_ref,      # (T, TB, O)
                      xp_ref,       # scratch (T, TB, 8H)  hoisted input projection
                      hsf_ref,      # scratch (T, TB, H)   forward hidden states
                      hsb_ref):     # scratch (T, TB, H)   backward hidden states
    T, TB, C = x_ref.shape
    G = wih_ref.shape[1]          # 8H
    H = G // 8
    G2 = 2 * H                    # width of one gate group [fwd | bwd]

    # ---- 1. hoisted input projection: one tall matmul, bias folded in ----
    x2d = x_ref[...].reshape(T * TB, C)
    proj = (jnp.dot(x2d, wih_ref[...], preferred_element_type=jnp.float32)
            + bias_ref[...])
    xp_ref[...] = proj.reshape(T, TB, G)

    whh = whh_ref[...]

    # lane mask selecting forward-direction columns (hoisted, built once)
    col = lax.broadcasted_iota(jnp.int32, (TB, G), 1)
    fwd_mask = (col % G2) < H

    h0 = jnp.zeros((TB, G2), jnp.float32)   # [h_fwd | h_bwd]
    c0 = jnp.zeros((TB, G2), jnp.float32)   # [c_fwd | c_bwd]

    # ---- 2. interleaved fwd/bwd recurrence, only h @ Whh on the hot path ----
    def body(t, carry):
        h_cat, c_cat = carry
        tt = T - 1 - t
        pf = xp_ref[t]                              # projection for fwd @ time t
        pb = xp_ref[tt]                             # projection for bwd @ time T-1-t
        x_part = jnp.where(fwd_mask, pf, pb)        # VPU select, no relayout
        gates = x_part + jnp.dot(h_cat, whh, preferred_element_type=jnp.float32)
        zs = jax.nn.sigmoid(gates)                  # full-width EUP pass
        zt = jnp.tanh(gates)                        # full-width EUP pass
        i_cat = zs[:, 0 * G2:1 * G2]
        f_cat = zs[:, 1 * G2:2 * G2]
        g_cat = zt[:, 2 * G2:3 * G2]
        o_cat = zs[:, 3 * G2:4 * G2]
        c_new = f_cat * c_cat + i_cat * g_cat
        h_new = o_cat * jnp.tanh(c_new)
        hsf_ref[t] = h_new[:, :H]
        hsb_ref[tt] = h_new[:, H:]
        return (h_new, c_new)

    unroll = True if T <= 32 else 8
    lax.fori_loop(0, T, body, (h0, c0), unroll=unroll)

    # ---- 3. FC head without any concatenate: split the 2H contraction ----
    hsf2d = hsf_ref[...].reshape(T * TB, H)
    hsb2d = hsb_ref[...].reshape(T * TB, H)
    out2d = (jnp.dot(hsf2d, fcw_f_ref[...], preferred_element_type=jnp.float32)
             + jnp.dot(hsb2d, fcw_b_ref[...], preferred_element_type=jnp.float32)
             + fcb_ref[...])
    out_ref[...] = out2d.reshape(T, TB, out_ref.shape[-1]).astype(out_ref.dtype)


# --------------------------------------------------------------------------
# Weight packing (gate-major, direction-minor column layout)
#   packed column index = gate*2H + dir*H + j,  gate order i,f,g,o (PyTorch)
# --------------------------------------------------------------------------
def _pack_params(params):
    H = params["hidden"]
    C = params["w_ih_f"].shape[1]
    O = 4 * H

    wf = params["w_ih_f"].T.reshape(C, 4, 1, H)
    wb = params["w_ih_b"].T.reshape(C, 4, 1, H)
    wih_perm = jnp.concatenate([wf, wb], axis=2).reshape(C, 8 * H)

    bf = (params["b_ih_f"] + params["b_hh_f"]).reshape(4, 1, H)
    bb = (params["b_ih_b"] + params["b_hh_b"]).reshape(4, 1, H)
    bias_perm = jnp.concatenate([bf, bb], axis=1).reshape(1, 8 * H)

    rf = params["w_hh_f"].T.reshape(H, 4, 1, H)
    rb = params["w_hh_b"].T.reshape(H, 4, 1, H)
    z = jnp.zeros((H, 4, 1, H), jnp.float32)
    top = jnp.concatenate([rf, z], axis=2).reshape(H, 8 * H)   # rows multiply h_fwd
    bot = jnp.concatenate([z, rb], axis=2).reshape(H, 8 * H)   # rows multiply h_bwd
    whh_perm = jnp.concatenate([top, bot], axis=0)             # (2H, 8H)

    fcw_t = params["fc_w"].T                                   # (2H, O)
    return (wih_perm, bias_perm, whh_perm,
            fcw_t[:H], fcw_t[H:], params["fc_b"].reshape(1, O))


# --------------------------------------------------------------------------
# Wrapper
# --------------------------------------------------------------------------
def decoder_with_rnn(x_nchw, params, *, block_b=8):
    """x_nchw: (B, C, 1, W) float32  ->  (B, W, 4*hidden)."""
    B, C, Hdim, W = x_nchw.shape
    assert Hdim == 1, "DecoderWithRNN expects spatial H == 1"
    H = params["hidden"]
    O = 4 * H
    T = W
    G = 8 * H

    wih_perm, bias_perm, whh_perm, fcw_f, fcw_b, fcb = _pack_params(params)

    # squeeze H, permute to (B, W, C), time-major (T, B, C); pad batch to
    # a full sublane multiple so matmul rows / vreg sublanes are not wasted.
    x_bwc = jnp.transpose(jnp.squeeze(x_nchw, axis=2), (0, 2, 1))
    x_tbc = jnp.transpose(x_bwc, (1, 0, 2))
    Bp = ((B + block_b - 1) // block_b) * block_b
    Bp = max(Bp, block_b)
    if Bp != B:
        x_tbc = jnp.pad(x_tbc, ((0, 0), (0, Bp - B), (0, 0)))

    grid = (Bp // block_b,)

    out_tbo = pl.pallas_call(
        _bilstm_fc_kernel,
        out_shape=jax.ShapeDtypeStruct((T, Bp, O), jnp.float32),
        grid_spec=pltpu.PrefetchScalarGridSpec(
            num_scalar_prefetch=0,
            grid=grid,
            in_specs=[
                pl.BlockSpec((T, block_b, C), lambda i: (0, i, 0)),
                pl.BlockSpec((C, G), lambda i: (0, 0)),
                pl.BlockSpec((1, G), lambda i: (0, 0)),
                pl.BlockSpec((2 * H, G), lambda i: (0, 0)),
                pl.BlockSpec((H, O), lambda i: (0, 0)),
                pl.BlockSpec((H, O), lambda i: (0, 0)),
                pl.BlockSpec((1, O), lambda i: (0, 0)),
            ],
            out_specs=pl.BlockSpec((T, block_b, O), lambda i: (0, i, 0)),
            scratch_shapes=[
                pltpu.VMEM((T, block_b, G), jnp.float32),   # hoisted input proj
                pltpu.VMEM((T, block_b, H), jnp.float32),   # fwd hidden states
                pltpu.VMEM((T, block_b, H), jnp.float32),   # bwd hidden states
            ],
        ),
        compiler_params=pltpu.CompilerParams(
            dimension_semantics=("parallel",),      # batch blocks independent (v7x 2 TCs)
            vmem_limit_bytes=64 * 1024 * 1024,
        ),
    )(x_tbc, wih_perm, bias_perm, whh_perm, fcw_f, fcw_b, fcb)

    return jnp.transpose(out_tbo, (1, 0, 2))[:B]    # (B, W, 4H)


# --------------------------------------------------------------------------
# Pure-JAX reference (for correctness check)
# --------------------------------------------------------------------------
def _lstm_dir_ref(x_btc, w_ih, w_hh, b_ih, b_hh, reverse):
    B, T, C = x_btc.shape
    H = w_hh.shape[1]
    xs = jnp.transpose(x_btc, (1, 0, 2))
    if reverse:
        xs = xs[::-1]

    def step(carry, x_t):
        h, c = carry
        gates = x_t @ w_ih.T + h @ w_hh.T + b_ih + b_hh
        i_g, f_g, g_g, o_g = jnp.split(gates, 4, axis=-1)
        i_g = jax.nn.sigmoid(i_g)
        f_g = jax.nn.sigmoid(f_g)
        g_g = jnp.tanh(g_g)
        o_g = jax.nn.sigmoid(o_g)
        c_new = f_g * c + i_g * g_g
        h_new = o_g * jnp.tanh(c_new)
        return (h_new, c_new), h_new

    h0 = jnp.zeros((B, H), jnp.float32)
    c0 = jnp.zeros((B, H), jnp.float32)
    _, hs = lax.scan(step, (h0, c0), xs)
    if reverse:
        hs = hs[::-1]
    return jnp.transpose(hs, (1, 0, 2))


def decoder_with_rnn_ref(x_nchw, params):
    x = jnp.squeeze(x_nchw, axis=2)
    x = jnp.transpose(x, (0, 2, 1))
    hf = _lstm_dir_ref(x, params["w_ih_f"], params["w_hh_f"],
                       params["b_ih_f"], params["b_hh_f"], reverse=False)
    hb = _lstm_dir_ref(x, params["w_ih_b"], params["w_hh_b"],
                       params["b_ih_b"], params["b_hh_b"], reverse=True)
    cat = jnp.concatenate([hf, hb], axis=-1)
    return cat @ params["fc_w"].T + params["fc_b"]


# --------------------------------------------------------------------------
# Deterministic parameter init (PyTorch-style uniform(-1/sqrt(H), 1/sqrt(H)))
# --------------------------------------------------------------------------
def init_params(key, in_channels, hidden):
    ks = jax.random.split(key, 12)
    k_lstm = 1.0 / jnp.sqrt(hidden)
    k_fc = 1.0 / jnp.sqrt(2 * hidden)
    u = lambda k, shape, bound: jax.random.uniform(
        k, shape, jnp.float32, -bound, bound)
    return {
        "hidden": hidden,
        "w_ih_f": u(ks[0], (4 * hidden, in_channels), k_lstm),
        "w_hh_f": u(ks[1], (4 * hidden, hidden), k_lstm),
        "b_ih_f": u(ks[2], (4 * hidden,), k_lstm),
        "b_hh_f": u(ks[3], (4 * hidden,), k_lstm),
        "w_ih_b": u(ks[4], (4 * hidden, in_channels), k_lstm),
        "w_hh_b": u(ks[5], (4 * hidden, hidden), k_lstm),
        "b_ih_b": u(ks[6], (4 * hidden,), k_lstm),
        "b_hh_b": u(ks[7], (4 * hidden,), k_lstm),
        "fc_w": u(ks[8], (4 * hidden, 2 * hidden), k_fc),
        "fc_b": u(ks[9], (4 * hidden,), k_fc),
    }


if __name__ == "__main__":
    B, C, W = 2, 16, 8        # batch, in_channels, sequence width
    HIDDEN = 32               # rnn_hidden_size

    key = jax.random.PRNGKey(0)
    k_x, k_p = jax.random.split(key)
    x = jax.random.normal(k_x, (B, C, 1, W), jnp.float32)   # NCHW, H == 1
    params = init_params(k_p, C, HIDDEN)

    run = jax.jit(functools.partial(decoder_with_rnn, params=params))
    out = jax.block_until_ready(run(x))
    assert out.shape == (B, W, 4 * HIDDEN), out.shape

    ref = decoder_with_rnn_ref(x, params)
    assert jnp.allclose(out, ref, atol=1e-4, rtol=1e-4), (
        float(jnp.max(jnp.abs(out - ref))))

    print("KERNEL_OK")
</pallas_src>

<mosaic_0001>
module attributes {stable_mosaic.version = 11 : i64} {
  func.func @_bilstm_fc_kernel(%arg0: i32, %arg1: memref<8x8x16xf32, #tpu.memory_space<vmem>>, %arg2: memref<16x256xf32, #tpu.memory_space<vmem>>, %arg3: memref<1x256xf32, #tpu.memory_space<vmem>>, %arg4: memref<64x256xf32, #tpu.memory_space<vmem>>, %arg5: memref<32x128xf32, #tpu.memory_space<vmem>>, %arg6: memref<32x128xf32, #tpu.memory_space<vmem>>, %arg7: memref<1x128xf32, #tpu.memory_space<vmem>>, %arg8: memref<8x8x128xf32, #tpu.memory_space<vmem>>, %arg9: memref<8x8x256xf32, #tpu.memory_space<vmem>>, %arg10: memref<8x8x32xf32, #tpu.memory_space<vmem>>, %arg11: memref<8x8x32xf32, #tpu.memory_space<vmem>>) attributes {dimension_semantics = [#tpu.dimension_semantics<parallel>], iteration_bounds = array<i64: 1>, scalar_prefetch = 0 : i64, scratch_operands = 3 : i64, tpu.core_type = #tpu.core_type<tc>, window_params = [{transform_indices = @transform_0, window_bounds = array<i64: 8, 8, 16>}, {pipeline_mode = #tpu.pipeline_mode<synchronous>, transform_indices = @transform_1, window_bounds = array<i64: 16, 256>}, {pipeline_mode = #tpu.pipeline_mode<synchronous>, transform_indices = @transform_2, window_bounds = array<i64: 1, 256>}, {pipeline_mode = #tpu.pipeline_mode<synchronous>, transform_indices = @transform_3, window_bounds = array<i64: 64, 256>}, {pipeline_mode = #tpu.pipeline_mode<synchronous>, transform_indices = @transform_4, window_bounds = array<i64: 32, 128>}, {pipeline_mode = #tpu.pipeline_mode<synchronous>, transform_indices = @transform_5, window_bounds = array<i64: 32, 128>}, {pipeline_mode = #tpu.pipeline_mode<synchronous>, transform_indices = @transform_6, window_bounds = array<i64: 1, 128>}, {transform_indices = @transform_7, window_bounds = array<i64: 8, 8, 128>}]} {
    %c0 = arith.constant 0 : index
    %c0_0 = arith.constant 0 : index
    %c0_1 = arith.constant 0 : index
    %0 = vector.load %arg1[%c0, %c0_0, %c0_1] : memref<8x8x16xf32, #tpu.memory_space<vmem>>, vector<8x8x16xf32>
    %1 = vector.shape_cast %0 : vector<8x8x16xf32> to vector<64x16xf32>
    %c0_2 = arith.constant 0 : index
    %c0_3 = arith.constant 0 : index
    %2 = vector.load %arg2[%c0_2, %c0_3] : memref<16x256xf32, #tpu.memory_space<vmem>>, vector<16x256xf32>
    %cst = arith.constant dense<0.000000e+00> : vector<64x256xf32>
    %3 = tpu.matmul %1, %2, %cst {dimension_numbers = #tpu.dot_dimension_numbers<[1], [0], [0], [1], [0, 0, 1, 1], [], []>} : vector<64x16xf32>, vector<16x256xf32>, vector<64x256xf32> -> vector<64x256xf32>
    %c0_4 = arith.constant 0 : index
    %c0_5 = arith.constant 0 : index
    %4 = vector.load %arg3[%c0_4, %c0_5] : memref<1x256xf32, #tpu.memory_space<vmem>>, vector<1x256xf32>
    %5 = vector.broadcast %4 : vector<1x256xf32> to vector<64x256xf32>
    %6 = arith.addf %3, %5 : vector<64x256xf32>
    %7 = vector.shape_cast %6 : vector<64x256xf32> to vector<8x8x256xf32>
    %c0_6 = arith.constant 0 : index
    %c0_7 = arith.constant 0 : index
    %c0_8 = arith.constant 0 : index
    %8 = vector.load %arg9[%c0_6, %c0_7, %c0_8] : memref<8x8x256xf32, #tpu.memory_space<vmem>>, vector<8x8x256xf32>
    tpu.vector_store %arg9[%c0_6, %c0_7, %c0_8], %7 {strides = array<i32>} : memref<8x8x256xf32, #tpu.memory_space<vmem>>, vector<8x8x256xf32>,
    %c0_9 = arith.constant 0 : index
    %c0_10 = arith.constant 0 : index
    %9 = vector.load %arg4[%c0_9, %c0_10] : memref<64x256xf32, #tpu.memory_space<vmem>>, vector<64x256xf32>
    %10 = tpu.iota {dimensions = array<i32: 1>} : vector<8x256xi32>
    %c64_i32 = arith.constant 64 : i32
    %c0_i32 = arith.constant 0 : i32
    %11 = arith.cmpi eq, %c64_i32, %c0_i32 : i32
    %c1_i32 = arith.constant 1 : i32
    %12 = arith.select %11, %c1_i32, %c64_i32 : i32
    %13 = vector.broadcast %12 : i32 to vector<8x256xi32>
    %14 = arith.remsi %10, %13 : vector<8x256xi32>
    %c0_i32_11 = arith.constant 0 : i32
    %15 = vector.broadcast %c0_i32_11 : i32 to vector<8x256xi32>
    %16 = arith.cmpi ne, %14, %15 : vector<8x256xi32>
    %c0_i32_12 = arith.constant 0 : i32
    %17 = vector.broadcast %c0_i32_12 : i32 to vector<8x256xi32>
    %18 = arith.cmpi slt, %14, %17 : vector<8x256xi32>
    %c0_i32_13 = arith.constant 0 : i32
    %19 = arith.cmpi slt, %12, %c0_i32_13 : i32
    %20 = vector.broadcast %19 : i1 to vector<8x256xi1>
    %21 = vector.broadcast %20 : vector<8x256xi1> to vector<8x256xi1>
    %22 = arith.xori %18, %21 : vector<8x256xi1>
    %23 = arith.andi %22, %16 : vector<8x256xi1>
    %24 = vector.broadcast %12 : i32 to vector<8x256xi32>
    %25 = arith.addi %14, %24 : vector<8x256xi32>
    %26 = arith.select %23, %25, %14 : vector<8x256xi1>, vector<8x256xi32>
    %c32_i32 = arith.constant 32 : i32
    %27 = vector.broadcast %c32_i32 : i32 to vector<8x256xi32>
    %28 = arith.cmpi slt, %26, %27 : vector<8x256xi32>
    %cst_14 = arith.constant 0.000000e+00 : f32
    %29 = vector.broadcast %cst_14 : f32 to vector<8x64xf32>
    %cst_15 = arith.constant 0.000000e+00 : f32
    %30 = vector.broadcast %cst_15 : f32 to vector<8x64xf32>
    %c0_i32_16 = arith.constant 0 : i32
    %c7_i32 = arith.constant 7 : i32
    %31 = arith.subi %c7_i32, %c0_i32_16 : i32
    %32 = arith.index_cast %c0_i32_16 : i32 to index
    %c0_17 = arith.constant 0 : index
    %c0_18 = arith.constant 0 : index
    %33 = vector.load %arg9[%32, %c0_17, %c0_18] : memref<8x8x256xf32, #tpu.memory_space<vmem>>, vector<1x8x256xf32>
    %34 = vector.shape_cast %33 : vector<1x8x256xf32> to vector<8x256xf32>
    %35 = arith.index_cast %31 : i32 to index
    %c0_19 = arith.constant 0 : index
    %c0_20 = arith.constant 0 : index
    %36 = vector.load %arg9[%35, %c0_19, %c0_20] : memref<8x8x256xf32, #tpu.memory_space<vmem>>, vector<1x8x256xf32>
    %37 = vector.shape_cast %36 : vector<1x8x256xf32> to vector<8x256xf32>
    %38 = arith.select %28, %34, %37 : vector<8x256xi1>, vector<8x256xf32>
    %cst_21 = arith.constant dense<0.000000e+00> : vector<8x256xf32>
    %39 = tpu.matmul %29, %9, %cst_21 {dimension_numbers = #tpu.dot_dimension_numbers<[1], [0], [0], [1], [0, 0, 1, 1], [], []>} : vector<8x64xf32>, vector<64x256xf32>, vector<8x256xf32> -> vector<8x256xf32>
    %40 = arith.addf %38, %39 : vector<8x256xf32>
    %41 = arith.negf %40 : vector<8x256xf32>
    %42 = math.exp %41 : vector<8x256xf32>
    %cst_22 = arith.constant 1.000000e+00 : f32
    %43 = vector.broadcast %cst_22 : f32 to vector<8x256xf32>
    %44 = arith.addf %43, %42 : vector<8x256xf32>
    %45 = arith.divf %43, %44 : vector<8x256xf32>
    %46 = math.tanh %40 : vector<8x256xf32>
    %47 = vector.extract_strided_slice %45 {offsets = [0, 0], sizes = [8, 64], strides = [1, 1]} : vector<8x256xf32> to vector<8x64xf32>
    %48 = vector.extract_strided_slice %45 {offsets = [0, 64], sizes = [8, 64], strides = [1, 1]} : vector<8x256xf32> to vector<8x64xf32>
    %49 = vector.extract_strided_slice %46 {offsets = [0, 128], sizes = [8, 64], strides = [1, 1]} : vector<8x256xf32> to vector<8x64xf32>
    %50 = vector.extract_strided_slice %45 {offsets = [0, 192], sizes = [8, 64], strides = [1, 1]} : vector<8x256xf32> to vector<8x64xf32>
    %51 = arith.mulf %48, %30 : vector<8x64xf32>
    %52 = arith.mulf %47, %49 : vector<8x64xf32>
    %53 = arith.addf %51, %52 : vector<8x64xf32>
    %54 = math.tanh %53 : vector<8x64xf32>
    %55 = arith.mulf %50, %54 : vector<8x64xf32>
    %56 = vector.extract_strided_slice %55 {offsets = [0, 0], sizes = [8, 32], strides = [1, 1]} : vector<8x64xf32> to vector<8x32xf32>
    %57 = arith.index_cast %c0_i32_16 : i32 to index
    %c0_23 = arith.constant 0 : index
    %c0_24 = arith.constant 0 : index
    %58 = vector.load %arg10[%57, %c0_23, %c0_24] : memref<8x8x32xf32, #tpu.memory_space<vmem>>, vector<1x8x32xf32>
    %59 = vector.shape_cast %58 : vector<1x8x32xf32> to vector<8x32xf32>
    %60 = vector.shape_cast %56 : vector<8x32xf32> to vector<1x8x32xf32>
    tpu.vector_store %arg10[%57, %c0_23, %c0_24], %60 {strides = array<i32>} : memref<8x8x32xf32, #tpu.memory_space<vmem>>, vector<1x8x32xf32>,
    %61 = vector.extract_strided_slice %55 {offsets = [0, 32], sizes = [8, 32], strides = [1, 1]} : vector<8x64xf32> to vector<8x32xf32>
    %62 = arith.index_cast %31 : i32 to index
    %c0_25 = arith.constant 0 : index
    %c0_26 = arith.constant 0 : index
    %63 = vector.load %arg11[%62, %c0_25, %c0_26] : memref<8x8x32xf32, #tpu.memory_space<vmem>>, vector<1x8x32xf32>
    %64 = vector.shape_cast %63 : vector<1x8x32xf32> to vector<8x32xf32>
    %65 = vector.shape_cast %61 : vector<8x32xf32> to vector<1x8x32xf32>
    tpu.vector_store %arg11[%62, %c0_25, %c0_26], %65 {strides = array<i32>} : memref<8x8x32xf32, #tpu.memory_space<vmem>>, vector<1x8x32xf32>,
    %c1_i32_27 = arith.constant 1 : i32
    %c7_i32_28 = arith.constant 7 : i32
    %66 = arith.subi %c7_i32_28, %c1_i32_27 : i32
    %67 = arith.index_cast %c1_i32_27 : i32 to index
    %c0_29 = arith.constant 0 : index
    %c0_30 = arith.constant 0 : index
    %68 = vector.load %arg9[%67, %c0_29, %c0_30] : memref<8x8x256xf32, #tpu.memory_space<vmem>>, vector<1x8x256xf32>
    %69 = vector.shape_cast %68 : vector<1x8x256xf32> to vector<8x256xf32>
    %70 = arith.index_cast %66 : i32 to index
    %c0_31 = arith.constant 0 : index
    %c0_32 = arith.constant 0 : index
    %71 = vector.load %arg9[%70, %c0_31, %c0_32] : memref<8x8x256xf32, #tpu.memory_space<vmem>>, vector<1x8x256xf32>
    %72 = vector.shape_cast %71 : vector<1x8x256xf32> to vector<8x256xf32>
    %73 = arith.select %28, %69, %72 : vector<8x256xi1>, vector<8x256xf32>
    %cst_33 = arith.constant dense<0.000000e+00> : vector<8x256xf32>
    %74 = tpu.matmul %55, %9, %cst_33 {dimension_numbers = #tpu.dot_dimension_numbers<[1], [0], [0], [1], [0, 0, 1, 1], [], []>} : vector<8x64xf32>, vector<64x256xf32>, vector<8x256xf32> -> vector<8x256xf32>
    %75 = arith.addf %73, %74 : vector<8x256xf32>
    %76 = arith.negf %75 : vector<8x256xf32>
    %77 = math.exp %76 : vector<8x256xf32>
    %cst_34 = arith.constant 1.000000e+00 : f32
    %78 = vector.broadcast %cst_34 : f32 to vector<8x256xf32>
    %79 = arith.addf %78, %77 : vector<8x256xf32>
    %80 = arith.divf %78, %79 : vector<8x256xf32>
    %81 = math.tanh %75 : vector<8x256xf32>
    %82 = vector.extract_strided_slice %80 {offsets = [0, 0], sizes = [8, 64], strides = [1, 1]} : vector<8x256xf32> to vector<8x64xf32>
    %83 = vector.extract_strided_slice %80 {offsets = [0, 64], sizes = [8, 64], strides = [1, 1]} : vector<8x256xf32> to vector<8x64xf32>
    %84 = vector.extract_strided_slice %81 {offsets = [0, 128], sizes = [8, 64], strides = [1, 1]} : vector<8x256xf32> to vector<8x64xf32>
    %85 = vector.extract_strided_slice %80 {offsets = [0, 192], sizes = [8, 64], strides = [1, 1]} : vector<8x256xf32> to vector<8x64xf32>
    %86 = arith.mulf %83, %53 : vector<8x64xf32>
    %87 = arith.mulf %82, %84 : vector<8x64xf32>
    %88 = arith.addf %86, %87 : vector<8x64xf32>
    %89 = math.tanh %88 : vector<8x64xf32>
    %90 = arith.mulf %85, %89 : vector<8x64xf32>
    %91 = vector.extract_strided_slice %90 {offsets = [0, 0], sizes = [8, 32], strides = [1, 1]} : vector<8x64xf32> to vector<8x32xf32>
    %92 = arith.index_cast %c1_i32_27 : i32 to index
    %c0_35 = arith.constant 0 : index
    %c0_36 = arith.constant 0 : index
    %93 = vector.load %arg10[%92, %c0_35, %c0_36] : memref<8x8x32xf32, #tpu.memory_space<vmem>>, vector<1x8x32xf32>
    %94 = vector.shape_cast %93 : vector<1x8x32xf32> to vector<8x32xf32>
    %95 = vector.shape_cast %91 : vector<8x32xf32> to vector<1x8x32xf32>
    tpu.vector_store %arg10[%92, %c0_35, %c0_36], %95 {strides = array<i32>} : memref<8x8x32xf32, #tpu.memory_space<vmem>>, vector<1x8x32xf32>,
    %96 = vector.extract_strided_slice %90 {offsets = [0, 32], sizes = [8, 32], strides = [1, 1]} : vector<8x64xf32> to vector<8x32xf32>
    %97 = arith.index_cast %66 : i32 to index
    %c0_37 = arith.constant 0 : index
    %c0_38 = arith.constant 0 : index
    %98 = vector.load %arg11[%97, %c0_37, %c0_38] : memref<8x8x32xf32, #tpu.memory_space<vmem>>, vector<1x8x32xf32>
    %99 = vector.shape_cast %98 : vector<1x8x32xf32> to vector<8x32xf32>
    %100 = vector.shape_cast %96 : vector<8x32xf32> to vector<1x8x32xf32>
    tpu.vector_store %arg11[%97, %c0_37, %c0_38], %100 {strides = array<i32>} : memref<8x8x32xf32, #tpu.memory_space<vmem>>, vector<1x8x32xf32>,
    %c2_i32 = arith.constant 2 : i32
    %c7_i32_39 = arith.constant 7 : i32
    %101 = arith.subi %c7_i32_39, %c2_i32 : i32
    %102 = arith.index_cast %c2_i32 : i32 to index
    %c0_40 = arith.constant 0 : index
    %c0_41 = arith.constant 0 : index
    %103 = vector.load %arg9[%102, %c0_40, %c0_41] : memref<8x8x256xf32, #tpu.memory_space<vmem>>, vector<1x8x256xf32>
    %104 = vector.shape_cast %103 : vector<1x8x256xf32> to vector<8x256xf32>
    %105 = arith.index_cast %101 : i32 to index
    %c0_42 = arith.constant 0 : index
    %c0_43 = arith.constant 0 : index
    %106 = vector.load %arg9[%105, %c0_42, %c0_43] : memref<8x8x256xf32, #tpu.memory_space<vmem>>, vector<1x8x256xf32>
    %107 = vector.shape_cast %106 : vector<1x8x256xf32> to vector<8x256xf32>
    %108 = arith.select %28, %104, %107 : vector<8x256xi1>, vector<8x256xf32>
    %cst_44 = arith.constant dense<0.000000e+00> : vector<8x256xf32>
    %109 = tpu.matmul %90, %9, %cst_44 {dimension_numbers = #tpu.dot_dimension_numbers<[1], [0], [0], [1], [0, 0, 1, 1], [], []>} : vector<8x64xf32>, vector<64x256xf32>, vector<8x256xf32> -> vector<8x256xf32>
    %110 = arith.addf %108, %109 : vector<8x256xf32>
    %111 = arith.negf %110 : vector<8x256xf32>
    %112 = math.exp %111 : vector<8x256xf32>
    %cst_45 = arith.constant 1.000000e+00 : f32
    %113 = vector.broadcast %cst_45 : f32 to vector<8x256xf32>
    %114 = arith.addf %113, %112 : vector<8x256xf32>
    %115 = arith.divf %113, %114 : vector<8x256xf32>
    %116 = math.tanh %110 : vector<8x256xf32>
    %117 = vector.extract_strided_slice %115 {offsets = [0, 0], sizes = [8, 64], strides = [1, 1]} : vector<8x256xf32> to vector<8x64xf32>
    %118 = vector.extract_strided_slice %115 {offsets = [0, 64], sizes = [8, 64], strides = [1, 1]} : vector<8x256xf32> to vector<8x64xf32>
    %119 = vector.extract_strided_slice %116 {offsets = [0, 128], sizes = [8, 64], strides = [1, 1]} : vector<8x256xf32> to vector<8x64xf32>
    %120 = vector.extract_strided_slice %115 {offsets = [0, 192], sizes = [8, 64], strides = [1, 1]} : vector<8x256xf32> to vector<8x64xf32>
    %121 = arith.mulf %118, %88 : vector<8x64xf32>
    %122 = arith.mulf %117, %119 : vector<8x64xf32>
    %123 = arith.addf %121, %122 : vector<8x64xf32>
    %124 = math.tanh %123 : vector<8x64xf32>
    %125 = arith.mulf %120, %124 : vector<8x64xf32>
    %126 = vector.extract_strided_slice %125 {offsets = [0, 0], sizes = [8, 32], strides = [1, 1]} : vector<8x64xf32> to vector<8x32xf32>
    %127 = arith.index_cast %c2_i32 : i32 to index
    %c0_46 = arith.constant 0 : index
    %c0_47 = arith.constant 0 : index
    %128 = vector.load %arg10[%127, %c0_46, %c0_47] : memref<8x8x32xf32, #tpu.memory_space<vmem>>, vector<1x8x32xf32>
    %129 = vector.shape_cast %128 : vector<1x8x32xf32> to vector<8x32xf32>
    %130 = vector.shape_cast %126 : vector<8x32xf32> to vector<1x8x32xf32>
    tpu.vector_store %arg10[%127, %c0_46, %c0_47], %130 {strides = array<i32>} : memref<8x8x32xf32, #tpu.memory_space<vmem>>, vector<1x8x32xf32>,
    %131 = vector.extract_strided_slice %125 {offsets = [0, 32], sizes = [8, 32], strides = [1, 1]} : vector<8x64xf32> to vector<8x32xf32>
    %132 = arith.index_cast %101 : i32 to index
    %c0_48 = arith.constant 0 : index
    %c0_49 = arith.constant 0 : index
    %133 = vector.load %arg11[%132, %c0_48, %c0_49] : memref<8x8x32xf32, #tpu.memory_space<vmem>>, vector<1x8x32xf32>
    %134 = vector.shape_cast %133 : vector<1x8x32xf32> to vector<8x32xf32>
    %135 = vector.shape_cast %131 : vector<8x32xf32> to vector<1x8x32xf32>
    tpu.vector_store %arg11[%132, %c0_48, %c0_49], %135 {strides = array<i32>} : memref<8x8x32xf32, #tpu.memory_space<vmem>>, vector<1x8x32xf32>,
    %c3_i32 = arith.constant 3 : i32
    %c7_i32_50 = arith.constant 7 : i32
    %136 = arith.subi %c7_i32_50, %c3_i32 : i32
    %137 = arith.index_cast %c3_i32 : i32 to index
    %c0_51 = arith.constant 0 : index
    %c0_52 = arith.constant 0 : index
    %138 = vector.load %arg9[%137, %c0_51, %c0_52] : memref<8x8x256xf32, #tpu.memory_space<vmem>>, vector<1x8x256xf32>
    %139 = vector.shape_cast %138 : vector<1x8x256xf32> to vector<8x256xf32>
    %140 = arith.index_cast %136 : i32 to index
    %c0_53 = arith.constant 0 : index
    %c0_54 = arith.constant 0 : index
    %141 = vector.load %arg9[%140, %c0_53, %c0_54] : memref<8x8x256xf32, #tpu.memory_space<vmem>>, vector<1x8x256xf32>
    %142 = vector.shape_cast %141 : vector<1x8x256xf32> to vector<8x256xf32>
    %143 = arith.select %28, %139, %142 : vector<8x256xi1>, vector<8x256xf32>
    %cst_55 = arith.constant dense<0.000000e+00> : vector<8x256xf32>
    %144 = tpu.matmul %125, %9, %cst_55 {dimension_numbers = #tpu.dot_dimension_numbers<[1], [0], [0], [1], [0, 0, 1, 1], [], []>} : vector<8x64xf32>, vector<64x256xf32>, vector<8x256xf32> -> vector<8x256xf32>
    %145 = arith.addf %143, %144 : vector<8x256xf32>
    %146 = arith.negf %145 : vector<8x256xf32>
    %147 = math.exp %146 : vector<8x256xf32>
    %cst_56 = arith.constant 1.000000e+00 : f32
    %148 = vector.broadcast %cst_56 : f32 to vector<8x256xf32>
    %149 = arith.addf %148, %147 : vector<8x256xf32>
    %150 = arith.divf %148, %149 : vector<8x256xf32>
    %151 = math.tanh %145 : vector<8x256xf32>
    %152 = vector.extract_strided_slice %150 {offsets = [0, 0], sizes = [8, 64], strides = [1, 1]} : vector<8x256xf32> to vector<8x64xf32>
    %153 = vector.extract_strided_slice %150 {offsets = [0, 64], sizes = [8, 64], strides = [1, 1]} : vector<8x256xf32> to vector<8x64xf32>
    %154 = vector.extract_strided_slice %151 {offsets = [0, 128], sizes = [8, 64], strides = [1, 1]} : vector<8x256xf32> to vector<8x64xf32>
    %155 = vector.extract_strided_slice %150 {offsets = [0, 192], sizes = [8, 64], strides = [1, 1]} : vector<8x256xf32> to vector<8x64xf32>
    %156 = arith.mulf %153, %123 : vector<8x64xf32>
    %157 = arith.mulf %152, %154 : vector<8x64xf32>
    %158 = arith.addf %156, %157 : vector<8x64xf32>
    %159 = math.tanh %158 : vector<8x64xf32>
    %160 = arith.mulf %155, %159 : vector<8x64xf32>
    %161 = vector.extract_strided_slice %160 {offsets = [0, 0], sizes = [8, 32], strides = [1, 1]} : vector<8x64xf32> to vector<8x32xf32>
    %162 = arith.index_cast %c3_i32 : i32 to index
    %c0_57 = arith.constant 0 : index
    %c0_58 = arith.constant 0 : index
    %163 = vector.load %arg10[%162, %c0_57, %c0_58] : memref<8x8x32xf32, #tpu.memory_space<vmem>>, vector<1x8x32xf32>
    %164 = vector.shape_cast %163 : vector<1x8x32xf32> to vector<8x32xf32>
    %165 = vector.shape_cast %161 : vector<8x32xf32> to vector<1x8x32xf32>
    tpu.vector_store %arg10[%162, %c0_57, %c0_58], %165 {strides = array<i32>} : memref<8x8x32xf32, #tpu.memory_space<vmem>>, vector<1x8x32xf32>,
    %166 = vector.extract_strided_slice %160 {offsets = [0, 32], sizes = [8, 32], strides = [1, 1]} : vector<8x64xf32> to vector<8x32xf32>
    %167 = arith.index_cast %136 : i32 to index
    %c0_59 = arith.constant 0 : index
    %c0_60 = arith.constant 0 : index
    %168 = vector.load %arg11[%167, %c0_59, %c0_60] : memref<8x8x32xf32, #tpu.memory_space<vmem>>, vector<1x8x32xf32>
    %169 = vector.shape_cast %168 : vector<1x8x32xf32> to vector<8x32xf32>
    %170 = vector.shape_cast %166 : vector<8x32xf32> to vector<1x8x32xf32>
    tpu.vector_store %arg11[%167, %c0_59, %c0_60], %170 {strides = array<i32>} : memref<8x8x32xf32, #tpu.memory_space<vmem>>, vector<1x8x32xf32>,
    %c4_i32 = arith.constant 4 : i32
    %c7_i32_61 = arith.constant 7 : i32
    %171 = arith.subi %c7_i32_61, %c4_i32 : i32
    %172 = arith.index_cast %c4_i32 : i32 to index
    %c0_62 = arith.constant 0 : index
    %c0_63 = arith.constant 0 : index
    %173 = vector.load %arg9[%172, %c0_62, %c0_63] : memref<8x8x256xf32, #tpu.memory_space<vmem>>, vector<1x8x256xf32>
    %174 = vector.shape_cast %173 : vector<1x8x256xf32> to vector<8x256xf32>
    %175 = arith.index_cast %171 : i32 to index
    %c0_64 = arith.constant 0 : index
    %c0_65 = arith.constant 0 : index
    %176 = vector.load %arg9[%175, %c0_64, %c0_65] : memref<8x8x256xf32, #tpu.memory_space<vmem>>, vector<1x8x256xf32>
    %177 = vector.shape_cast %176 : vector<1x8x256xf32> to vector<8x256xf32>
    %178 = arith.select %28, %174, %177 : vector<8x256xi1>, vector<8x256xf32>
    %cst_66 = arith.constant dense<0.000000e+00> : vector<8x256xf32>
    %179 = tpu.matmul %160, %9, %cst_66 {dimension_numbers = #tpu.dot_dimension_numbers<[1], [0], [0], [1], [0, 0, 1, 1], [], []>} : vector<8x64xf32>, vector<64x256xf32>, vector<8x256xf32> -> vector<8x256xf32>
    %180 = arith.addf %178, %179 : vector<8x256xf32>
    %181 = arith.negf %180 : vector<8x256xf32>
    %182 = math.exp %181 : vector<8x256xf32>
    %cst_67 = arith.constant 1.000000e+00 : f32
    %183 = vector.broadcast %cst_67 : f32 to vector<8x256xf32>
    %184 = arith.addf %183, %182 : vector<8x256xf32>
    %185 = arith.divf %183, %184 : vector<8x256xf32>
    %186 = math.tanh %180 : vector<8x256xf32>
    %187 = vector.extract_strided_slice %185 {offsets = [0, 0], sizes = [8, 64], strides = [1, 1]} : vector<8x256xf32> to vector<8x64xf32>
    %188 = vector.extract_strided_slice %185 {offsets = [0, 64], sizes = [8, 64], strides = [1, 1]} : vector<8x256xf32> to vector<8x64xf32>
    %189 = vector.extract_strided_slice %186 {offsets = [0, 128], sizes = [8, 64], strides = [1, 1]} : vector<8x256xf32> to vector<8x64xf32>
    %190 = vector.extract_strided_slice %185 {offsets = [0, 192], sizes = [8, 64], strides = [1, 1]} : vector<8x256xf32> to vector<8x64xf32>
    %191 = arith.mulf %188, %158 : vector<8x64xf32>
    %192 = arith.mulf %187, %189 : vector<8x64xf32>
    %193 = arith.addf %191, %192 : vector<8x64xf32>
    %194 = math.tanh %193 : vector<8x64xf32>
    %195 = arith.mulf %190, %194 : vector<8x64xf32>
    %196 = vector.extract_strided_slice %195 {offsets = [0, 0], sizes = [8, 32], strides = [1, 1]} : vector<8x64xf32> to vector<8x32xf32>
    %197 = arith.index_cast %c4_i32 : i32 to index
    %c0_68 = arith.constant 0 : index
    %c0_69 = arith.constant 0 : index
    %198 = vector.load %arg10[%197, %c0_68, %c0_69] : memref<8x8x32xf32, #tpu.memory_space<vmem>>, vector<1x8x32xf32>
    %199 = vector.shape_cast %198 : vector<1x8x32xf32> to vector<8x32xf32>
    %200 = vector.shape_cast %196 : vector<8x32xf32> to vector<1x8x32xf32>
    tpu.vector_store %arg10[%197, %c0_68, %c0_69], %200 {strides = array<i32>} : memref<8x8x32xf32, #tpu.memory_space<vmem>>, vector<1x8x32xf32>,
    %201 = vector.extract_strided_slice %195 {offsets = [0, 32], sizes = [8, 32], strides = [1, 1]} : vector<8x64xf32> to vector<8x32xf32>
    %202 = arith.index_cast %171 : i32 to index
    %c0_70 = arith.constant 0 : index
    %c0_71 = arith.constant 0 : index
    %203 = vector.load %arg11[%202, %c0_70, %c0_71] : memref<8x8x32xf32, #tpu.memory_space<vmem>>, vector<1x8x32xf32>
    %204 = vector.shape_cast %203 : vector<1x8x32xf32> to vector<8x32xf32>
    %205 = vector.shape_cast %201 : vector<8x32xf32> to vector<1x8x32xf32>
    tpu.vector_store %arg11[%202, %c0_70, %c0_71], %205 {strides = array<i32>} : memref<8x8x32xf32, #tpu.memory_space<vmem>>, vector<1x8x32xf32>,
    %c5_i32 = arith.constant 5 : i32
    %c7_i32_72 = arith.constant 7 : i32
    %206 = arith.subi %c7_i32_72, %c5_i32 : i32
    %207 = arith.index_cast %c5_i32 : i32 to index
    %c0_73 = arith.constant 0 : index
    %c0_74 = arith.constant 0 : index
    %208 = vector.load %arg9[%207, %c0_73, %c0_74] : memref<8x8x256xf32, #tpu.memory_space<vmem>>, vector<1x8x256xf32>
    %209 = vector.shape_cast %208 : vector<1x8x256xf32> to vector<8x256xf32>
    %210 = arith.index_cast %206 : i32 to index
    %c0_75 = arith.constant 0 : index
    %c0_76 = arith.constant 0 : index
    %211 = vector.load %arg9[%210, %c0_75, %c0_76] : memref<8x8x256xf32, #tpu.memory_space<vmem>>, vector<1x8x256xf32>
    %212 = vector.shape_cast %211 : vector<1x8x256xf32> to vector<8x256xf32>
    %213 = arith.select %28, %209, %212 : vector<8x256xi1>, vector<8x256xf32>
    %cst_77 = arith.constant dense<0.000000e+00> : vector<8x256xf32>
    %214 = tpu.matmul %195, %9, %cst_77 {dimension_numbers = #tpu.dot_dimension_numbers<[1], [0], [0], [1], [0, 0, 1, 1], [], []>} : vector<8x64xf32>, vector<64x256xf32>, vector<8x256xf32> -> vector<8x256xf32>
    %215 = arith.addf %213, %214 : vector<8x256xf32>
    %216 = arith.negf %215 : vector<8x256xf32>
    %217 = math.exp %216 : vector<8x256xf32>
    %cst_78 = arith.constant 1.000000e+00 : f32
    %218 = vector.broadcast %cst_78 : f32 to vector<8x256xf32>
    %219 = arith.addf %218, %217 : vector<8x256xf32>
    %220 = arith.divf %218, %219 : vector<8x256xf32>
    %221 = math.tanh %215 : vector<8x256xf32>
    %222 = vector.extract_strided_slice %220 {offsets = [0, 0], sizes = [8, 64], strides = [1, 1]} : vector<8x256xf32> to vector<8x64xf32>
    %223 = vector.extract_strided_slice %220 {offsets = [0, 64], sizes = [8, 64], strides = [1, 1]} : vector<8x256xf32> to vector<8x64xf32>
    %224 = vector.extract_strided_slice %221 {offsets = [0, 128], sizes = [8, 64], strides = [1, 1]} : vector<8x256xf32> to vector<8x64xf32>
    %225 = vector.extract_strided_slice %220 {offsets = [0, 192], sizes = [8, 64], strides = [1, 1]} : vector<8x256xf32> to vector<8x64xf32>
    %226 = arith.mulf %223, %193 : vector<8x64xf32>
    %227 = arith.mulf %222, %224 : vector<8x64xf32>
    %228 = arith.addf %226, %227 : vector<8x64xf32>
    %229 = math.tanh %228 : vector<8x64xf32>
    %230 = arith.mulf %225, %229 : vector<8x64xf32>
    %231 = vector.extract_strided_slice %230 {offsets = [0, 0], sizes = [8, 32], strides = [1, 1]} : vector<8x64xf32> to vector<8x32xf32>
    %232 = arith.index_cast %c5_i32 : i32 to index
    %c0_79 = arith.constant 0 : index
    %c0_80 = arith.constant 0 : index
    %233 = vector.load %arg10[%232, %c0_79, %c0_80] : memref<8x8x32xf32, #tpu.memory_space<vmem>>, vector<1x8x32xf32>
    %234 = vector.shape_cast %233 : vector<1x8x32xf32> to vector<8x32xf32>
    %235 = vector.shape_cast %231 : vector<8x32xf32> to vector<1x8x32xf32>
    tpu.vector_store %arg10[%232, %c0_79, %c0_80], %235 {strides = array<i32>} : memref<8x8x32xf32, #tpu.memory_space<vmem>>, vector<1x8x32xf32>,
    %236 = vector.extract_strided_slice %230 {offsets = [0, 32], sizes = [8, 32], strides = [1, 1]} : vector<8x64xf32> to vector<8x32xf32>
    %237 = arith.index_cast %206 : i32 to index
    %c0_81 = arith.constant 0 : index
    %c0_82 = arith.constant 0 : index
    %238 = vector.load %arg11[%237, %c0_81, %c0_82] : memref<8x8x32xf32, #tpu.memory_space<vmem>>, vector<1x8x32xf32>
    %239 = vector.shape_cast %238 : vector<1x8x32xf32> to vector<8x32xf32>
    %240 = vector.shape_cast %236 : vector<8x32xf32> to vector<1x8x32xf32>
    tpu.vector_store %arg11[%237, %c0_81, %c0_82], %240 {strides = array<i32>} : memref<8x8x32xf32, #tpu.memory_space<vmem>>, vector<1x8x32xf32>,
    %c6_i32 = arith.constant 6 : i32
    %c7_i32_83 = arith.constant 7 : i32
    %241 = arith.subi %c7_i32_83, %c6_i32 : i32
    %242 = arith.index_cast %c6_i32 : i32 to index
    %c0_84 = arith.constant 0 : index
    %c0_85 = arith.constant 0 : index
    %243 = vector.load %arg9[%242, %c0_84, %c0_85] : memref<8x8x256xf32, #tpu.memory_space<vmem>>, vector<1x8x256xf32>
    %244 = vector.shape_cast %243 : vector<1x8x256xf32> to vector<8x256xf32>
    %245 = arith.index_cast %241 : i32 to index
    %c0_86 = arith.constant 0 : index
    %c0_87 = arith.constant 0 : index
    %246 = vector.load %arg9[%245, %c0_86, %c0_87] : memref<8x8x256xf32, #tpu.memory_space<vmem>>, vector<1x8x256xf32>
    %247 = vector.shape_cast %246 : vector<1x8x256xf32> to vector<8x256xf32>
    %248 = arith.select %28, %244, %247 : vector<8x256xi1>, vector<8x256xf32>
    %cst_88 = arith.constant dense<0.000000e+00> : vector<8x256xf32>
    %249 = tpu.matmul %230, %9, %cst_88 {dimension_numbers = #tpu.dot_dimension_numbers<[1], [0], [0], [1], [0, 0, 1, 1], [], []>} : vector<8x64xf32>, vector<64x256xf32>, vector<8x256xf32> -> vector<8x256xf32>
    %250 = arith.addf %248, %249 : vector<8x256xf32>
    %251 = arith.negf %250 : vector<8x256xf32>
    %252 = math.exp %251 : vector<8x256xf32>
    %cst_89 = arith.constant 1.000000e+00 : f32
    %253 = vector.broadcast %cst_89 : f32 to vector<8x256xf32>
    %254 = arith.addf %253, %252 : vector<8x256xf32>
    %255 = arith.divf %253, %254 : vector<8x256xf32>
    %256 = math.tanh %250 : vector<8x256xf32>
    %257 = vector.extract_strided_slice %255 {offsets = [0, 0], sizes = [8, 64], strides = [1, 1]} : vector<8x256xf32> to vector<8x64xf32>
    %258 = vector.extract_strided_slice %255 {offsets = [0, 64], sizes = [8, 64], strides = [1, 1]} : vector<8x256xf32> to vector<8x64xf32>
    %259 = vector.extract_strided_slice %256 {offsets = [0, 128], sizes = [8, 64], strides = [1, 1]} : vector<8x256xf32> to vector<8x64xf32>
    %260 = vector.extract_strided_slice %255 {offsets = [0, 192], sizes = [8, 64], strides = [1, 1]} : vector<8x256xf32> to vector<8x64xf32>
    %261 = arith.mulf %258, %228 : vector<8x64xf32>
    %262 = arith.mulf %257, %259 : vector<8x64xf32>
    %263 = arith.addf %261, %262 : vector<8x64xf32>
    %264 = math.tanh %263 : vector<8x64xf32>
    %265 = arith.mulf %260, %264 : vector<8x64xf32>
    %266 = vector.extract_strided_slice %265 {offsets = [0, 0], sizes = [8, 32], strides = [1, 1]} : vector<8x64xf32> to vector<8x32xf32>
    %267 = arith.index_cast %c6_i32 : i32 to index
    %c0_90 = arith.constant 0 : index
    %c0_91 = arith.constant 0 : index
    %268 = vector.load %arg10[%267, %c0_90, %c0_91] : memref<8x8x32xf32, #tpu.memory_space<vmem>>, vector<1x8x32xf32>
    %269 = vector.shape_cast %268 : vector<1x8x32xf32> to vector<8x32xf32>
    %270 = vector.shape_cast %266 : vector<8x32xf32> to vector<1x8x32xf32>
    tpu.vector_store %arg10[%267, %c0_90, %c0_91], %270 {strides = array<i32>} : memref<8x8x32xf32, #tpu.memory_space<vmem>>, vector<1x8x32xf32>,
    %271 = vector.extract_strided_slice %265 {offsets = [0, 32], sizes = [8, 32], strides = [1, 1]} : vector<8x64xf32> to vector<8x32xf32>
    %272 = arith.index_cast %241 : i32 to index
    %c0_92 = arith.constant 0 : index
    %c0_93 = arith.constant 0 : index
    %273 = vector.load %arg11[%272, %c0_92, %c0_93] : memref<8x8x32xf32, #tpu.memory_space<vmem>>, vector<1x8x32xf32>
    %274 = vector.shape_cast %273 : vector<1x8x32xf32> to vector<8x32xf32>
    %275 = vector.shape_cast %271 : vector<8x32xf32> to vector<1x8x32xf32>
    tpu.vector_store %arg11[%272, %c0_92, %c0_93], %275 {strides = array<i32>} : memref<8x8x32xf32, #tpu.memory_space<vmem>>, vector<1x8x32xf32>,
    %c7_i32_94 = arith.constant 7 : i32
    %c7_i32_95 = arith.constant 7 : i32
    %276 = arith.subi %c7_i32_95, %c7_i32_94 : i32
    %277 = arith.index_cast %c7_i32_94 : i32 to index
    %c0_96 = arith.constant 0 : index
    %c0_97 = arith.constant 0 : index
    %278 = vector.load %arg9[%277, %c0_96, %c0_97] : memref<8x8x256xf32, #tpu.memory_space<vmem>>, vector<1x8x256xf32>
    %279 = vector.shape_cast %278 : vector<1x8x256xf32> to vector<8x256xf32>
    %280 = arith.index_cast %276 : i32 to index
    %c0_98 = arith.constant 0 : index
    %c0_99 = arith.constant 0 : index
    %281 = vector.load %arg9[%280, %c0_98, %c0_99] : memref<8x8x256xf32, #tpu.memory_space<vmem>>, vector<1x8x256xf32>
    %282 = vector.shape_cast %281 : vector<1x8x256xf32> to vector<8x256xf32>
    %283 = arith.select %28, %279, %282 : vector<8x256xi1>, vector<8x256xf32>
    %cst_100 = arith.constant dense<0.000000e+00> : vector<8x256xf32>
    %284 = tpu.matmul %265, %9, %cst_100 {dimension_numbers = #tpu.dot_dimension_numbers<[1], [0], [0], [1], [0, 0, 1, 1], [], []>} : vector<8x64xf32>, vector<64x256xf32>, vector<8x256xf32> -> vector<8x256xf32>
    %285 = arith.addf %283, %284 : vector<8x256xf32>
    %286 = arith.negf %285 : vector<8x256xf32>
    %287 = math.exp %286 : vector<8x256xf32>
    %cst_101 = arith.constant 1.000000e+00 : f32
    %288 = vector.broadcast %cst_101 : f32 to vector<8x256xf32>
    %289 = arith.addf %288, %287 : vector<8x256xf32>
    %290 = arith.divf %288, %289 : vector<8x256xf32>
    %291 = math.tanh %285 : vector<8x256xf32>
    %292 = vector.extract_strided_slice %290 {offsets = [0, 0], sizes = [8, 64], strides = [1, 1]} : vector<8x256xf32> to vector<8x64xf32>
    %293 = vector.extract_strided_slice %290 {offsets = [0, 64], sizes = [8, 64], strides = [1, 1]} : vector<8x256xf32> to vector<8x64xf32>
    %294 = vector.extract_strided_slice %291 {offsets = [0, 128], sizes = [8, 64], strides = [1, 1]} : vector<8x256xf32> to vector<8x64xf32>
    %295 = vector.extract_strided_slice %290 {offsets = [0, 192], sizes = [8, 64], strides = [1, 1]} : vector<8x256xf32> to vector<8x64xf32>
    %296 = arith.mulf %293, %263 : vector<8x64xf32>
    %297 = arith.mulf %292, %294 : vector<8x64xf32>
    %298 = arith.addf %296, %297 : vector<8x64xf32>
    %299 = math.tanh %298 : vector<8x64xf32>
    %300 = arith.mulf %295, %299 : vector<8x64xf32>
    %301 = vector.extract_strided_slice %300 {offsets = [0, 0], sizes = [8, 32], strides = [1, 1]} : vector<8x64xf32> to vector<8x32xf32>
    %302 = arith.index_cast %c7_i32_94 : i32 to index
    %c0_102 = arith.constant 0 : index
    %c0_103 = arith.constant 0 : index
    %303 = vector.load %arg10[%302, %c0_102, %c0_103] : memref<8x8x32xf32, #tpu.memory_space<vmem>>, vector<1x8x32xf32>
    %304 = vector.shape_cast %303 : vector<1x8x32xf32> to vector<8x32xf32>
    %305 = vector.shape_cast %301 : vector<8x32xf32> to vector<1x8x32xf32>
    tpu.vector_store %arg10[%302, %c0_102, %c0_103], %305 {strides = array<i32>} : memref<8x8x32xf32, #tpu.memory_space<vmem>>, vector<1x8x32xf32>,
    %306 = vector.extract_strided_slice %300 {offsets = [0, 32], sizes = [8, 32], strides = [1, 1]} : vector<8x64xf32> to vector<8x32xf32>
    %307 = arith.index_cast %276 : i32 to index
    %c0_104 = arith.constant 0 : index
    %c0_105 = arith.constant 0 : index
    %308 = vector.load %arg11[%307, %c0_104, %c0_105] : memref<8x8x32xf32, #tpu.memory_space<vmem>>, vector<1x8x32xf32>
    %309 = vector.shape_cast %308 : vector<1x8x32xf32> to vector<8x32xf32>
    %310 = vector.shape_cast %306 : vector<8x32xf32> to vector<1x8x32xf32>
    tpu.vector_store %arg11[%307, %c0_104, %c0_105], %310 {strides = array<i32>} : memref<8x8x32xf32, #tpu.memory_space<vmem>>, vector<1x8x32xf32>,
    %c8_i32 = arith.constant 8 : i32
    %c0_106 = arith.constant 0 : index
    %c0_107 = arith.constant 0 : index
    %c0_108 = arith.constant 0 : index
    %311 = vector.load %arg10[%c0_106, %c0_107, %c0_108] : memref<8x8x32xf32, #tpu.memory_space<vmem>>, vector<8x8x32xf32>
    %312 = vector.shape_cast %311 : vector<8x8x32xf32> to vector<64x32xf32>
    %c0_109 = arith.constant 0 : index
    %c0_110 = arith.constant 0 : index
    %c0_111 = arith.constant 0 : index
    %313 = vector.load %arg11[%c0_109, %c0_110, %c0_111] : memref<8x8x32xf32, #tpu.memory_space<vmem>>, vector<8x8x32xf32>
    %314 = vector.shape_cast %313 : vector<8x8x32xf32> to vector<64x32xf32>
    %c0_112 = arith.constant 0 : index
    %c0_113 = arith.constant 0 : index
    %315 = vector.load %arg5[%c0_112, %c0_113] : memref<32x128xf32, #tpu.memory_space<vmem>>, vector<32x128xf32>
    %cst_114 = arith.constant dense<0.000000e+00> : vector<64x128xf32>
    %316 = tpu.matmul %312, %315, %cst_114 {dimension_numbers = #tpu.dot_dimension_numbers<[1], [0], [0], [1], [0, 0, 1, 1], [], []>} : vector<64x32xf32>, vector<32x128xf32>, vector<64x128xf32> -> vector<64x128xf32>
    %c0_115 = arith.constant 0 : index
    %c0_116 = arith.constant 0 : index
    %317 = vector.load %arg6[%c0_115, %c0_116] : memref<32x128xf32, #tpu.memory_space<vmem>>, vector<32x128xf32>
    %cst_117 = arith.constant dense<0.000000e+00> : vector<64x128xf32>
    %318 = tpu.matmul %314, %317, %cst_117 {dimension_numbers = #tpu.dot_dimension_numbers<[1], [0], [0], [1], [0, 0, 1, 1], [], []>} : vector<64x32xf32>, vector<32x128xf32>, vector<64x128xf32> -> vector<64x128xf32>
    %319 = arith.addf %316, %318 : vector<64x128xf32>
    %c0_118 = arith.constant 0 : index
    %c0_119 = arith.constant 0 : index
    %320 = vector.load %arg7[%c0_118, %c0_119] : memref<1x128xf32, #tpu.memory_space<vmem>>, vector<1x128xf32>
    %321 = vector.broadcast %320 : vector<1x128xf32> to vector<64x128xf32>
    %322 = arith.addf %319, %321 : vector<64x128xf32>
    %323 = vector.shape_cast %322 : vector<64x128xf32> to vector<8x8x128xf32>
    %c0_120 = arith.constant 0 : index
    %c0_121 = arith.constant 0 : index
    %c0_122 = arith.constant 0 : index
    %324 = vector.load %arg8[%c0_120, %c0_121, %c0_122] : memref<8x8x128xf32, #tpu.memory_space<vmem>>, vector<8x8x128xf32>
    tpu.vector_store %arg8[%c0_120, %c0_121, %c0_122], %323 {strides = array<i32>} : memref<8x8x128xf32, #tpu.memory_space<vmem>>, vector<8x8x128xf32>,
    return
  }
  func.func @transform_0(%arg0: i32) -> (i32, i32, i32) {
    %c0_i32 = arith.constant 0 : i32
    %c0_i32_0 = arith.constant 0 : i32
    %c0_i32_1 = arith.constant 0 : i32
    return %c0_i32, %arg0, %c0_i32_0 : i32, i32, i32
  }
  func.func @transform_1(%arg0: i32) -> (i32, i32) {
    %c0_i32 = arith.constant 0 : i32
    %c0_i32_0 = arith.constant 0 : i32
    %c0_i32_1 = arith.constant 0 : i32
    return %c0_i32, %c0_i32_0 : i32, i32
  }
  func.func @transform_2(%arg0: i32) -> (i32, i32) {
    %c0_i32 = arith.constant 0 : i32
    %c0_i32_0 = arith.constant 0 : i32
    %c0_i32_1 = arith.constant 0 : i32
    return %c0_i32, %c0_i32_0 : i32, i32
  }
  func.func @transform_3(%arg0: i32) -> (i32, i32) {
    %c0_i32 = arith.constant 0 : i32
    %c0_i32_0 = arith.constant 0 : i32
    %c0_i32_1 = arith.constant 0 : i32
    return %c0_i32, %c0_i32_0 : i32, i32
  }
  func.func @transform_4(%arg0: i32) -> (i32, i32) {
    %c0_i32 = arith.constant 0 : i32
    %c0_i32_0 = arith.constant 0 : i32
    %c0_i32_1 = arith.constant 0 : i32
    return %c0_i32, %c0_i32_0 : i32, i32
  }
  func.func @transform_5(%arg0: i32) -> (i32, i32) {
    %c0_i32 = arith.constant 0 : i32
    %c0_i32_0 = arith.constant 0 : i32
    %c0_i32_1 = arith.constant 0 : i32
    return %c0_i32, %c0_i32_0 : i32, i32
  }
  func.func @transform_6(%arg0: i32) -> (i32, i32) {
    %c0_i32 = arith.constant 0 : i32
    %c0_i32_0 = arith.constant 0 : i32
    %c0_i32_1 = arith.constant 0 : i32
    return %c0_i32, %c0_i32_0 : i32, i32
  }
  func.func @transform_7(%arg0: i32) -> (i32, i32, i32) {
    %c0_i32 = arith.constant 0 : i32
    %c0_i32_0 = arith.constant 0 : i32
    %c0_i32_1 = arith.constant 0 : i32
    return %c0_i32, %arg0, %c0_i32_0 : i32, i32, i32
  }
}

</mosaic_0001>

<bundles_post_ra>
// kernel: decoder_with_rnn.1
= control target key start
LH: loop header
LB: loop body
LE: loop exit
PB: predicated region body
PF: predicated region fallthrough
CT: control target
= control target key end

     0   :  { %12 = vsyncpa [#allocation6], 0  ;;  %s2696_s0 = inlined_call_operand.hbm [shape: f32[8,8,16], index: 0, kind: input, shape index: {}]   ;;  %s2697_s1 = inlined_call_operand.hbm [shape: f32[16,256], index: 1, kind: input, shape index: {}]   ;;  %s2698_s2 = inlined_call_operand.hbm [shape: f32[1,256], index: 2, kind: input, shape index: {}]   ;;  %s2699_s3 = inlined_call_operand.hbm [shape: f32[64,256], index: 3, kind: input, shape index: {}]   ;;  %s2700_s4 = inlined_call_operand.hbm [shape: f32[32,128], index: 4, kind: input, shape index: {}]   ;;  %s2701_s5 = inlined_call_operand.hbm [shape: f32[32,128], index: 5, kind: input, shape index: {}]   ;;  %s2702_s6 = inlined_call_operand.hbm [shape: f32[1,128], index: 6, kind: input, shape index: {}]   ;;  %s2703_s7 = inlined_call_operand.hbm [shape: f32[8,8,128], index: 7, kind: output, shape index: {}]  }
   0x1   :  { %13 = vsyncpa [#allocation9], 0 }
   0x2   :  { %14 = vsyncpa [#allocation12], 0 }
   0x3   :  { %15 = vsyncpa [#allocation15], 0 }
   0x4   :  { %16 = vsyncpa [#allocation7], 0  ;;  %s2153_s24 = smov [#allocation8]   ;;  %s1967_s28 = scalar_lea.hbm %s2697_s1, 512 }
   0x5   :  { %s34_s25 = sshll.u32 %s2153_s24, 4  ;;  %p1968_p0 = scmp.ne.s32.totalorder %s2697_s1, %s1967_s28  ;;  %s35_s25 = int_to_ptr.vmem [resolvable:$true] %s34_s25 }
   0x6   :  { %p1971_p1 = scmp.lt.u32.totalorder %s1967_s28, %s2697_s1 }
   0x8   :  { %p1973_p2 = pnand %p1971_p1, %p1968_p0 }
   0xa   :  { %1976 = shalt.err (!%p1973_p2)
}
   0xb   :  { %s1977_s10 = scalar_lea.vmem %s35_s25, 512  ;;  %p1982_p4 = scmp.lt.s32.totalorder %s35_s25, %s35_s25 }
   0xc   :  { %p1978_p3 = scmp.ne.s32.totalorder %s35_s25, %s1977_s10  ;;  %p1983_p5 = scmp.lt.s32.totalorder %s1977_s10, %s1977_s10 }
   0xe   :  { %p1984_p6 = por %p1983_p5, %p1982_p4 }
  0x10   :  { %p1985_p7 = pnand %p1984_p6, %p1978_p3 }
  0x12   :  { %1988 = shalt.err (!%p1985_p7)
}
  0x13   :  { %s2154_s11 = smov 256   ;;  %s2155_s12 = smov 16  }
  0x14   :  { %40 = dma.hbm_to_vmem [thread:$0]  %s2697_s1, 512, %s35_s25, [#allocation9], %s2154_s11, %s2154_s11, %s2155_s12  }
  0x15   :  { %s2156_s15 = smov [#allocation11]   ;;  %s1989_s19 = scalar_lea.hbm %s2699_s3, 2048 }
  0x16   :  { %s56_s16 = sshll.u32 %s2156_s15, 4  ;;  %p1990_p8 = scmp.ne.s32.totalorder %s2699_s3, %s1989_s19  ;;  %s57_s16 = int_to_ptr.vmem [resolvable:$true] %s56_s16 }
  0x17   :  { %p1993_p9 = scmp.lt.u32.totalorder %s1989_s19, %s2699_s3 }
  0x19   :  { %p1995_p10 = pnand %p1993_p9, %p1990_p8 }
  0x1b   :  { %1998 = shalt.err (!%p1995_p10)
}
  0x1c   :  { %s1999_s24 = scalar_lea.vmem %s57_s16, 2048  ;;  %p2004_p12 = scmp.lt.s32.totalorder %s57_s16, %s57_s16 }
  0x1d   :  { %p2000_p11 = scmp.ne.s32.totalorder %s57_s16, %s1999_s24  ;;  %p2005_p13 = scmp.lt.s32.totalorder %s1999_s24, %s1999_s24 }
  0x1f   :  { %p2006_p0 = por %p2005_p13, %p2004_p12 }
  0x21   :  { %p2007_p1 = pnand %p2006_p0, %p2000_p11 }
  0x23   :  { %2010 = shalt.err (!%p2007_p1)
}
  0x24   :  { %62 = dma.hbm_to_vmem [thread:$0]  %s2699_s3, 2048, %s57_s16, [#allocation12], %s2154_s11, %s2154_s11, %s2155_s12  }
  0x25   :  { %s2157_s26 = smov [#allocation14]   ;;  %s2158_s28 = smov [#allocation5]  }
  0x26   :  { %s80_s27 = sshll.u32 %s2157_s26, 4  ;;  %s22_s29 = sshll.u32 %s2158_s28, 4  ;;  %s81_s27 = int_to_ptr.vmem [resolvable:$true] %s80_s27  ;;  %s2232_s29 = int_to_ptr.vmem [resolvable:$true] %s22_s29 }
  0x27   :  { %s2011_s9 = scalar_lea.hbm %s2701_s5, 512 }
  0x28   :  { %p2012_p2 = scmp.ne.s32.totalorder %s2701_s5, %s2011_s9  ;;  %p2015_p3 = scmp.lt.u32.totalorder %s2011_s9, %s2701_s5 }
  0x2a   :  { %p2017_p4 = pnand %p2015_p3, %p2012_p2 }
  0x2c   :  { %2020 = shalt.err (!%p2017_p4)
}
  0x2d   :  { %s2021_s3 = scalar_lea.vmem %s81_s27, 512  ;;  %p2026_p6 = scmp.lt.s32.totalorder %s81_s27, %s81_s27 }
  0x2e   :  { %p2022_p5 = scmp.ne.s32.totalorder %s81_s27, %s2021_s3  ;;  %p2027_p7 = scmp.lt.s32.totalorder %s2021_s3, %s2021_s3 }
  0x30   :  { %p2028_p8 = por %p2027_p7, %p2026_p6 }
  0x32   :  { %p2029_p9 = pnand %p2028_p8, %p2022_p5 }
  0x34   :  { %2032 = shalt.err (!%p2029_p9)
}
  0x35   :  { %s2159_s11 = smov 128   ;;  %s2160_s12 = smov 8  }
  0x36   :  { %86 = dma.hbm_to_vmem [thread:$0]  %s2701_s5, 512, %s81_s27, [#allocation15], %s2159_s11, %s2159_s11, %s2160_s12  }
  0x37   :  { %s2033_s20 = scalar_lea.hbm %s2696_s0, 1024 }
  0x38   :  { %p2034_p10 = scmp.ne.s32.totalorder %s2696_s0, %s2033_s20  ;;  %p2037_p11 = scmp.lt.u32.totalorder %s2033_s20, %s2696_s0 }
  0x3a   :  { %p2039_p12 = pnand %p2037_p11, %p2034_p10 }
  0x3c   :  { %2042 = shalt.err (!%p2039_p12)
}
  0x3d   :  { %s2043_s1 = scalar_lea.vmem %s2232_s29, 1024  ;;  %p2048_p0 = scmp.lt.s32.totalorder %s2232_s29, %s2232_s29 }
  0x3e   :  { %p2044_p13 = scmp.ne.s32.totalorder %s2232_s29, %s2043_s1  ;;  %p2049_p1 = scmp.lt.s32.totalorder %s2043_s1, %s2043_s1 }
  0x40   :  { %p2050_p2 = por %p2049_p1, %p2048_p0 }
  0x42   :  { %p2051_p3 = pnand %p2050_p2, %p2044_p13 }
  0x44   :  { %2054 = shalt.err (!%p2051_p3)
}
  0x45   :  { %28 = dma.hbm_to_vmem [thread:$0]  %s2696_s0, 1024, %s2232_s29, [#allocation6], %s2159_s11, %s2159_s11, %s2160_s12  }
  0x46   :  { %s2161_s26 = smov [#allocation10]   ;;  %s2162_s28 = smov [#allocation13]  }
  0x47   :  { %s47_s27 = sshll.u32 %s2161_s26, 4  ;;  %s68_s30 = sshll.u32 %s2162_s28, 4  ;;  %s48_s27 = int_to_ptr.vmem [resolvable:$true] %s47_s27  ;;  %s2269_s30 = int_to_ptr.vmem [resolvable:$true] %s68_s30 }
  0x48   :  { %s2055_s10 = scalar_lea.hbm %s2698_s2, 32 }
  0x49   :  { %p2056_p4 = scmp.ne.s32.totalorder %s2698_s2, %s2055_s10  ;;  %p2059_p5 = scmp.lt.u32.totalorder %s2055_s10, %s2698_s2 }
  0x4b   :  { %p2061_p6 = pnand %p2059_p5, %p2056_p4 }
  0x4d   :  { %2064 = shalt.err (!%p2061_p6)
}
  0x4e   :  { %s2065_s0 = scalar_lea.vmem %s48_s27, 32  ;;  %p2070_p8 = scmp.lt.s32.totalorder %s48_s27, %s48_s27 }
  0x4f   :  { %p2066_p7 = scmp.ne.s32.totalorder %s48_s27, %s2065_s0  ;;  %p2071_p9 = scmp.lt.s32.totalorder %s2065_s0, %s2065_s0 }
  0x51   :  { %p2072_p10 = por %p2071_p9, %p2070_p8 }
  0x53   :  { %p2073_p11 = pnand %p2072_p10, %p2066_p7 }
  0x55   :  { %2076 = shalt.err (!%p2073_p11)
}
  0x56   :  { %50 = dma.hbm_to_vmem [thread:$0]  %s2698_s2, 32, %s48_s27, [#allocation9]  }
  0x57   :  { %s2077_s19 = scalar_lea.hbm %s2700_s4, 512 }
  0x58   :  { %p2078_p12 = scmp.ne.s32.totalorder %s2700_s4, %s2077_s19  ;;  %p2081_p13 = scmp.lt.u32.totalorder %s2077_s19, %s2700_s4 }
  0x5a   :  { %p2083_p0 = pnand %p2081_p13, %p2078_p12 }
  0x5c   :  { %2086 = shalt.err (!%p2083_p0)
}
  0x5d   :  { %s2087_s24 = scalar_lea.vmem %s2269_s30, 512  ;;  %p2092_p2 = scmp.lt.s32.totalorder %s2269_s30, %s2269_s30 }
  0x5e   :  { %p2088_p1 = scmp.ne.s32.totalorder %s2269_s30, %s2087_s24  ;;  %p2093_p3 = scmp.lt.s32.totalorder %s2087_s24, %s2087_s24 }
  0x60   :  { %p2094_p4 = por %p2093_p3, %p2092_p2 }
  0x62   :  { %p2095_p5 = pnand %p2094_p4, %p2088_p1 }
  0x64   :  { %2098 = shalt.err (!%p2095_p5)
}
  0x65   :  { %74 = dma.hbm_to_vmem [thread:$0]  %s2700_s4, 512, %s2269_s30, [#allocation12], %s2159_s11, %s2159_s11, %s2160_s12  }
  0x66   :  { %s2163_s5 = smov [#allocation16]   ;;  %s2099_s28 = scalar_lea.hbm %s2702_s6, 16 }
  0x67   :  { %s93_s25 = sshll.u32 %s2163_s5, 4  ;;  %p2100_p6 = scmp.ne.s32.totalorder %s2702_s6, %s2099_s28  ;;  %s94_s25 = int_to_ptr.vmem [resolvable:$true] %s93_s25 }
  0x68   :  { %p2103_p7 = scmp.lt.u32.totalorder %s2099_s28, %s2702_s6 }
  0x6a   :  { %p2105_p8 = pnand %p2103_p7, %p2100_p6 }
  0x6c   :  { %2108 = shalt.err (!%p2105_p8)
}
  0x6d   :  { %s2109_s14 = scalar_lea.vmem %s94_s25, 16  ;;  %s2113_s4 = scalar_lea.vmem %s94_s25, 32 }
  0x6e   :  { %p2110_p9 = scmp.ne.s32.totalorder %s94_s25, %s2109_s14  ;;  %p2114_p10 = scmp.lt.s32.totalorder %s94_s25, %s94_s25 }
  0x6f   :  { %p2115_p11 = scmp.lt.s32.totalorder %s2113_s4, %s2109_s14 }
  0x71   :  { %p2116_p12 = por %p2115_p11, %p2114_p10 }
  0x73   :  { %p2117_p13 = pnand %p2116_p12, %p2110_p9 }
  0x75   :  { %2120 = shalt.err (!%p2117_p13)
}
  0x76   :  { %96 = dma.hbm_to_vmem [thread:$0]  %s2702_s6, 16, %s94_s25, [#allocation15]  }
  0x77   :  { %2143 = dma.done.wait [#allocation6], 1024  }
  0x78   :  { %2144 = vsyncadd [#allocation6], 4294966272 }
  0x79   :  { %2145 = dma.done.wait [#allocation9], 544  }
  0x7a   :  { %2146 = vsyncadd [#allocation9], 4294966752 }
  0x7b   :  { %2147 = dma.done.wait [#allocation12], 2560  }
  0x7c   :  { %2148 = vsyncadd [#allocation12], 4294964736 }
  0x7d   :  { %2149 = dma.done.wait [#allocation15], 528  }
  0x7e   :  { %2150 = vsyncadd [#allocation15], 4294966768  ;;  %v2164_v0 = vmov 0.0   ;;  %v127_v1 = vld [vmem:[#allocation8 + $0x8] sm:$0xff]  ;;  %v129_v2 = vld [vmem:[#allocation8 + $0x18] sm:$0xff]  ;;  %vm142_vm0 = vcmask 130048   ;;  %v132_v39 = vlaneseq }
  0x7f   :  { %231 = vmatprep.mubr.f32.mxu0 %v2164_v0  ;;  %255 = vmatprep.mubr.f32.mxu1 %v2164_v0  ;;  %v126_v3 = vld [vmem:[#allocation8] sm:$0xff]  ;;  %v1698_v4 = vpack.c.bf16 %v129_v2, %v127_v1  ;;  %v128_v5 = vld [vmem:[#allocation8 + $0x10] sm:$0xff]  ;;  %v119_v22 = vld [vmem:[#allocation5 + $0x8] sm:$0xff]  ;;  %s2165_s6 = smov 64   ;;  %vm451_vm3 = vcmask 261120   ;;  %vm348_vm4 = vcmask 523264  }
  0x80   :  { %v1700_v6 = vpack.c.bf16 %v128_v5, %v126_v3  ;;  %v297_v7 = vld [vmem:[#allocation11 + $0x8] sm:$0xff]  ;;  %v299_v8 = vld [vmem:[#allocation11 + $0x18] sm:$0xff]  ;;  %v296_v9 = vld [vmem:[#allocation11] sm:$0xff]  ;;  %v133_v40 = vshrl.u32 %v132_v39, 7  ;;  %v313_v45 = vand.u32 127, %v132_v39  ;;  %s2166_s3 = smov 32  }
  0x81   :  { %1699 = vmatprep.subr.bf16.mxu0 %v1698_v4  ;;  %1846 = vmatprep.subr.bf16.mxu1 %v1698_v4  ;;  %v118_v10 = vld [vmem:[#allocation5] sm:$0xff]  ;;  %v2317_v11 = vpack.c.bf16 %v299_v8, %v297_v7  ;;  %v298_v12 = vld [vmem:[#allocation11 + $0x10] sm:$0xff]  ;;  %v301_v15 = vld [vmem:[#allocation11 + $0x28] sm:$0xff]  ;;  %s2167_s0 = smov [#allocation17]  }
  0x82   :  { %1701 = vmatpush1.bf16.msra.mxu0 %v1700_v6  ;;  %1847 = vmatpush1.bf16.msra.mxu1 %v1700_v6  ;;  %v122_v13 = vld [vmem:[#allocation5 + $0x20] sm:$0xff]  ;;  %v2319_v14 = vpack.c.bf16 %v298_v12, %v296_v9  ;;  %v302_v19 = vld [vmem:[#allocation11 + $0x30] sm:$0xff]  ;;  %v305_v20 = vld [vmem:[#allocation11 + $0x48] sm:$0xff]  ;;  %v134_v41 = vsub.s32 0, %v133_v40  ;;  %v138_v43 = vsub.s32 1, %v133_v40  ;;  %v314_v52 = vadd.s32 128, %v313_v45 }
  0x83   :  { %v303_v16 = vld [vmem:[#allocation11 + $0x38] sm:$0xff]  ;;  %1703 = vmatprep.subr.bf16.mxu1 %v2317_v11  ;;  %v300_v18 = vld [vmem:[#allocation11 + $0x20] sm:$0xff]  ;;  %1735 = vmatprep.subr.bf16.mxu0 %v2317_v11  ;;  %v306_v27 = vld [vmem:[#allocation11 + $0x50] sm:$0xff]  ;;  %v319_v56 = vand.u32 63, %v313_v45  ;;  %s1571_s29 = sshll.u32 %s2167_s0, 4  ;;  %s1572_s29 = int_to_ptr.vmem [resolvable:$true] %s1571_s29 }
  0x84   :  { %v2322_v17 = vpack.c.bf16 %v303_v16, %v301_v15  ;;  %v307_v21 = vld [vmem:[#allocation11 + $0x58] sm:$0xff]  ;;  %v123_v23 = vld [vmem:[#allocation5 + $0x28] sm:$0xff]  ;;  %v2329_v24 = vpack.c.bf16 %v302_v19, %v300_v18  ;;  %v120_v30 = vld [vmem:[#allocation5 + $0x10] sm:$0xff]  ;;  %v326_v61 = vand.u32 63, %v314_v52  ;;  %s2121_s16 = scalar_lea.vmem %s1572_s29, 1024  ;;  %p2126_p1 = scmp.lt.s32.totalorder %s1572_s29, %s1572_s29 }
  0x85   :  { %1586 = vmatmul.mubr.msk.f32.vlgmr.msra.gmra.mrb[0].mxu0 %vm142_vm0, %v118_v10  ;;  %1590 = vmatmul.mubr.msk.f32.vlgmr.msra.gmra.mrb[0].mxu1 %vm142_vm0, %v122_v13  ;;  %v2333_v25 = vpack.c.bf16 %v307_v21, %v305_v20  ;;  %v304_v26 = vld [vmem:[#allocation11 + $0x40] sm:$0xff]  ;;  %v309_v28 = vld [vmem:[#allocation11 + $0x68] sm:$0xff]  ;;  %v311_v29 = vld [vmem:[#allocation11 + $0x78] sm:$0xff]  ;;  %vm2389_vm1 = vcmp.lt.s32.totalorder %v319_v56, 32  ;;  %p2122_p0 = scmp.ne.s32.totalorder %s1572_s29, %s2121_s16  ;;  %p2127_p2 = scmp.lt.s32.totalorder %s2121_s16, %s2121_s16 }
  0x86   :  { %1705 = vmatpush1.bf16.msra.mxu1 %v2319_v14  ;;  %237 = vmatprep.mubr.f32.mxu0 %v2164_v0  ;;  %v124_v31 = vld [vmem:[#allocation5 + $0x30] sm:$0xff]  ;;  %v2340_v32 = vpack.c.bf16 %v306_v27, %v304_v26  ;;  %v2344_v33 = vpack.c.bf16 %v311_v29, %v309_v28  ;;  %v308_v34 = vld [vmem:[#allocation11 + $0x60] sm:$0xff]  ;;  %v121_v36 = vld [vmem:[#allocation5 + $0x18] sm:$0xff]  ;;  %vm2397_vm2 = vcmp.lt.s32.totalorder %v326_v61, 32 }
  0x87   :  { %261 = vmatprep.mubr.f32.mxu1 %v2164_v0  ;;  %1707 = vmatprep.subr.bf16.mxu1 %v2322_v17  ;;  %v310_v35 = vld [vmem:[#allocation11 + $0x70] sm:$0xff]  ;;  %v130_v42 = vld [vmem:[#allocation10] sm:$0x3]  ;;  %p2128_p3 = por %p2127_p2, %p2126_p1 }
  0x88   :  { %1737 = vmatpush1.bf16.msra.mxu0 %v2319_v14  ;;  %v125_v37 = vld [vmem:[#allocation5 + $0x38] sm:$0xff]  ;;  %v2351_v38 = vpack.c.bf16 %v310_v35, %v308_v34  ;;  %v135_v44 = vrot.slane %v130_v42, %v134_v41  ;;  %v139_v46 = vrot.slane %v130_v42, %v138_v43 }
  0x89   :  { %1587 = vmatmul.mubr.msk.f32.gmra.mrb[2].mxu0 %vm142_vm0, %v119_v22  ;;  %1591 = vmatmul.mubr.msk.f32.gmra.mrb[2].mxu1 %vm142_vm0, %v123_v23  ;;  %p2129_p4 = pnand %p2128_p3, %p2122_p0 }
  0x8a   :  { %1709 = vmatpush1.bf16.msra.mxu1 %v2329_v24  ;;  %243 = vmatprep.mubr.f32.mxu0 %v2164_v0 }
  0x8b   :  { %267 = vmatprep.mubr.f32.mxu1 %v2164_v0  ;;  %1711 = vmatprep.subr.bf16.mxu1 %v2333_v25 }
  0x8c   :  { %1739 = vmatprep.subr.bf16.mxu0 %v2322_v17 }
  0x8d   :  { %1588 = vmatmul.mubr.msk.f32.gmra.mrb[4].mxu0 %vm142_vm0, %v120_v30  ;;  %1592 = vmatmul.mubr.msk.f32.gmra.mrb[4].mxu1 %vm142_vm0, %v124_v31 }
  0x8e   :  { %1713 = vmatpush1.bf16.msra.mxu1 %v2340_v32  ;;  %249 = vmatprep.mubr.f32.mxu0 %v2164_v0 }
  0x8f   :  { %273 = vmatprep.mubr.f32.mxu1 %v2164_v0  ;;  %1715 = vmatprep.subr.bf16.mxu1 %v2344_v33 }
  0x90   :  { %1741 = vmatpush1.bf16.msra.mxu0 %v2329_v24 }
  0x91   :  { %1589 = vmatmul.mubr.msk.f32.gmra.mrb[6].mxu0 %vm142_vm0, %v121_v36  ;;  %1593 = vmatmul.mubr.msk.f32.gmra.mrb[6].mxu1 %vm142_vm0, %v125_v37 }
  0x92   :  { %1717 = vmatpush1.bf16.msra.mxu1 %v2351_v38  ;;  %416 = vmatprep.mubr.f32.mxu1 %v2164_v0 }
  0x93   :  { %1719 = vmatprep.subr.bf16.mxu1 %v2317_v11  ;;  %1743 = vmatprep.subr.bf16.mxu0 %v2333_v25 }
  0x94   :  { %1745 = vmatpush1.bf16.msra.mxu0 %v2340_v32  ;;  %648 = vmatprep.mubr.f32.mxu0 %v2164_v0 }
  0x95   :  { %417 = vmatmul.mubr.f32.vlgmr.msra.gmra.mrb[8].mxu1 %v2164_v0  ;;  %1747 = vmatprep.subr.bf16.mxu0 %v2344_v33 }
  0x96   :  { %1721 = vmatpush1.bf16.msra.mxu1 %v2319_v14  ;;  %532 = vmatprep.mubr.f32.mxu1 %v2164_v0 }
  0x97   :  { %1723 = vmatprep.subr.bf16.mxu1 %v2322_v17 }
  0x98   :  { %1749 = vmatpush1.bf16.msra.mxu0 %v2351_v38 }
  0x99   :  { %1767 = vmatprep.subr.bf16.mxu0 %v2317_v11 }
  0x9a   :  { %1725 = vmatpush1.bf16.msra.mxu1 %v2329_v24 }
  0x9b   :  { %1727 = vmatprep.subr.bf16.mxu1 %v2333_v25 }
  0x9e   :  { %1729 = vmatpush1.bf16.msra.mxu1 %v2340_v32 }
  0x9f   :  { %1731 = vmatprep.subr.bf16.mxu1 %v2344_v33 }
  0xa2   :  { %1733 = vmatpush1.bf16.msra.mxu1 %v2351_v38 }
  0xa3   :  { %1751 = vmatprep.subr.bf16.mxu1 %v2317_v11 }
 0x158   :  { %v257_v47 = vpop.f32.mrb[0].mxu1  ;;  %v233_v48 = vpop.f32.mrb[0].mxu0 }
 0x159   :  { %v2377_v49 = vadd.f32 %v257_v47, %v135_v44  ;;  %v259_v50 = vpop.f32.mrb[1].mxu1  ;;  %v235_v51 = vpop.f32.mrb[1].mxu0  ;;  %v2401_v9 = vadd.f32 %v233_v48, %v135_v44 }
 0x15a   :  { %v2379_v53 = vadd.f32 %v259_v50, %v139_v46  ;;  %v2403_v10 = vadd.f32 %v235_v51, %v139_v46 }
 0x15c   :  { %v263_v54 = vpop.f32.mrb[2].mxu1  ;;  %v239_v55 = vpop.f32.mrb[2].mxu0 }
 0x15d   :  { %v2381_v57 = vadd.f32 %v263_v54, %v135_v44  ;;  %v265_v58 = vpop.f32.mrb[3].mxu1  ;;  %v2383_v59 = vadd.f32 %v239_v55, %v135_v44  ;;  %v241_v60 = vpop.f32.mrb[3].mxu0 }
 0x15e   :  { %v2385_v62 = vadd.f32 %v265_v58, %v139_v46  ;;  %v2387_v63 = vadd.f32 %v241_v60, %v139_v46 }
 0x160   :  { %v245_v1 = vpop.f32.mrb[4].mxu0  ;;  %v269_v2 = vpop.f32.mrb[4].mxu1 }
 0x161   :  { %v2393_v4 = vadd.f32 %v245_v1, %v135_v44  ;;  %v2395_v5 = vadd.f32 %v269_v2, %v135_v44  ;;  %v247_v6 = vpop.f32.mrb[5].mxu0  ;;  %v271_v7 = vpop.f32.mrb[5].mxu1 }
 0x162   :  { %v2405_v12 = vadd.f32 %v247_v6, %v139_v46  ;;  %v2407_v13 = vadd.f32 %v271_v7, %v139_v46 }
 0x163   :  { %v464_v15 = vsel %vm2389_vm1, %v2383_v59, %v2395_v5  ;;  %v580_v16 = vsel %vm2389_vm1, %v2393_v4, %v2381_v57  ;;  %v924_v18 = vsel %vm2389_vm1, %v2381_v57, %v2393_v4  ;;  %v1038_v19 = vsel %vm2389_vm1, %v2395_v5, %v2383_v59 }
 0x164   :  { %v251_v20 = vpop.f32.mrb[6].mxu0  ;;  %v275_v21 = vpop.f32.mrb[6].mxu1  ;;  %v465_v22 = vsel %vm2397_vm2, %v2387_v63, %v2407_v13  ;;  %v581_v23 = vsel %vm2397_vm2, %v2405_v12, %v2385_v62  ;;  %v925_v26 = vsel %vm2397_vm2, %v2385_v62, %v2405_v12  ;;  %v1039_v27 = vsel %vm2397_vm2, %v2407_v13, %v2387_v63 }
 0x165   :  { %v2441_v28 = vadd.f32 %v251_v20, %v135_v44  ;;  %v2443_v29 = vadd.f32 %v275_v21, %v135_v44  ;;  %v253_v30 = vpop.f32.mrb[7].mxu0  ;;  %v277_v31 = vpop.f32.mrb[7].mxu1 }
 0x166   :  { %v2445_v34 = vadd.f32 %v253_v30, %v139_v46  ;;  %v2447_v35 = vadd.f32 %v277_v31, %v139_v46 }
 0x167   :  { %v346_v36 = vsel %vm2389_vm1, %v2401_v9, %v2443_v29  ;;  %v696_v37 = vsel %vm2389_vm1, %v2441_v28, %v2377_v49  ;;  %v810_v39 = vsel %vm2389_vm1, %v2377_v49, %v2441_v28  ;;  %v1152_v40 = vsel %vm2389_vm1, %v2443_v29, %v2401_v9 }
 0x168   :  { %v418_v41 = vpop.f32.mrb[8].mxu1  ;;  %v347_v42 = vsel %vm2397_vm2, %v2403_v10, %v2447_v35  ;;  %v697_v43 = vsel %vm2397_vm2, %v2445_v34, %v2379_v53  ;;  %v811_v44 = vsel %vm2397_vm2, %v2379_v53, %v2445_v34  ;;  %v1153_v45 = vsel %vm2397_vm2, %v2447_v35, %v2403_v10 }
 0x169   :  { %v423_v46 = vadd.f32 %v418_v41, %v346_v36  ;;  %v420_v47 = vpop.f32.mrb[9].mxu1 }
 0x16a   :  { %v424_v48 = vadd.f32 %v420_v47, %v347_v42 }
 0x16b   :  { %v1594_v50 = vmul.f32 -1.442695, %v423_v46 }
 0x16c   :  { %v1595_v58 = vmul.f32 -1.442695, %v424_v48 }
 0x16d   :  { %1871 = vpow2.f32 %v1594_v50 }
 0x16e   :  { %1873 = vtanh.f32 %v424_v48 }
 0x177   :  { %v1872_v51 = vpop.eup %1871 }
 0x178   :  { %v431_v52 = vadd.f32 1.0, %v1872_v51  ;;  %v1874_v54 = vpop.eup %1873 }
 0x17a   :  { %1875 = vrcp.f32 %v431_v52 }
 0x17b   :  { %1877 = vpow2.f32 %v1595_v58 }
 0x184   :  { %v1876_v55 = vpop.eup %1875 }
 0x185   :  { %v439_v56 = vmul.f32 %v1876_v55, %v1874_v54  ;;  %v1878_v60 = vpop.eup %1877  ;;  %v438_v1 = vmul.f32 0.0, %v1876_v55 }
 0x186   :  { %v432_v61 = vadd.f32 1.0, %v1878_v60 }
 0x187   :  { %441 = vrot.lane.b32.xlu0 %v439_v56, %s2165_s6 }
 0x188   :  { %1879 = vrcp.f32 %v432_v61 }
 0x192   :  { %v1880_v7 = vpop.eup %1879 }
 0x1f9   :  { %v442_v2 = vpop.permute.xlu0 %441 }
 0x1fa   :  { %v444_v6 = vadd.f32 %v442_v2, %v438_v1 }
 0x1fc   :  { %1881 = vtanh.f32 %v444_v6 }
 0x206   :  { %v1882_v20 = vpop.eup %1881 }
 0x207   :  { %v2482_v21 = vmul.f32 %v1882_v20, %v1880_v7 }
 0x209   :  { %448 = vrot.lane.b32.xlu0 %v2482_v21, %s2165_s6 }
 0x27b   :  { %v449_v30 = vpop.permute.xlu0 %448 }
 0x27c   :  { %452 = vst.msk [vmem:[#allocation3] sm:$0xff] %vm451_vm3, %v449_v30  ;;  %1596 = vmatmul.mubr.msk.f32.vlgmr.msra.gmra.mrb[10].mxu1 %vm348_vm4, %v449_v30 }
 0x27d   :  { %1753 = vmatpush1.bf16.msra.mxu1 %v2319_v14  ;;  %764 = vmatprep.mubr.f32.mxu1 %v2164_v0 }
 0x27e   :  { %1755 = vmatprep.subr.bf16.mxu1 %v2322_v17 }
 0x281   :  { %1757 = vmatpush1.bf16.msra.mxu1 %v2329_v24 }
 0x282   :  { %1759 = vmatprep.subr.bf16.mxu1 %v2333_v25 }
 0x285   :  { %1761 = vmatpush1.bf16.msra.mxu1 %v2340_v32 }
 0x286   :  { %1763 = vmatprep.subr.bf16.mxu1 %v2344_v33 }
 0x289   :  { %1765 = vmatpush1.bf16.msra.mxu1 %v2351_v38 }
 0x28a   :  { %1783 = vmatprep.subr.bf16.mxu1 %v2317_v11 }
 0x34f   :  { %v534_v31 = vpop.f32.mrb[10].mxu1 }
 0x350   :  { %v539_v36 = vadd.f32 %v534_v31, %v464_v15  ;;  %v536_v41 = vpop.f32.mrb[11].mxu1 }
 0x351   :  { %v540_v42 = vadd.f32 %v536_v41, %v465_v22 }
 0x352   :  { %v1597_v46 = vmul.f32 -1.442695, %v539_v36 }
 0x353   :  { %v1598_v54 = vmul.f32 -1.442695, %v540_v42 }
 0x354   :  { %1883 = vpow2.f32 %v1597_v46 }
 0x355   :  { %1885 = vtanh.f32 %v540_v42 }
 0x35e   :  { %v1884_v47 = vpop.eup %1883 }
 0x35f   :  { %v547_v48 = vadd.f32 1.0, %v1884_v47  ;;  %v1886_v50 = vpop.eup %1885 }
 0x361   :  { %1887 = vrcp.f32 %v547_v48 }
 0x362   :  { %1889 = vpow2.f32 %v1598_v54 }
 0x36b   :  { %v1888_v51 = vpop.eup %1887 }
 0x36c   :  { %v555_v52 = vmul.f32 %v1888_v51, %v1886_v50  ;;  %v1890_v15 = vpop.eup %1889  ;;  %v554_v56 = vmul.f32 %v1888_v51, %v444_v6 }
 0x36d   :  { %v548_v55 = vadd.f32 1.0, %v1890_v15 }
 0x36e   :  { %557 = vrot.lane.b32.xlu1 %v555_v52, %s2165_s6 }
 0x36f   :  { %1891 = vrcp.f32 %v548_v55 }
 0x379   :  { %v1892_v22 = vpop.eup %1891 }
 0x3e0   :  { %v558_v58 = vpop.permute.xlu1 %557 }
 0x3e1   :  { %v560_v60 = vadd.f32 %v558_v58, %v554_v56 }
 0x3e3   :  { %1893 = vtanh.f32 %v560_v60 }
 0x3ed   :  { %v1894_v61 = vpop.eup %1893 }
 0x3ee   :  { %v2508_v1 = vmul.f32 %v1894_v61, %v1892_v22 }
 0x3f0   :  { %564 = vrot.lane.b32.xlu1 %v2508_v1, %s2165_s6 }
 0x462   :  { %v565_v2 = vpop.permute.xlu1 %564 }
 0x463   :  { %568 = vst.msk [vmem:[#allocation3 + $0x8] sm:$0xff] %vm451_vm3, %v565_v2  ;;  %1599 = vmatmul.mubr.msk.f32.vlgmr.msra.gmra.mrb[8].mxu0 %vm348_vm4, %v565_v2 }
 0x464   :  { %1769 = vmatpush1.bf16.msra.mxu0 %v2319_v14  ;;  %878 = vmatprep.mubr.f32.mxu0 %v2164_v0 }
 0x465   :  { %1771 = vmatprep.subr.bf16.mxu0 %v2322_v17 }
 0x468   :  { %1773 = vmatpush1.bf16.msra.mxu0 %v2329_v24 }
 0x469   :  { %1775 = vmatprep.subr.bf16.mxu0 %v2333_v25 }
 0x46c   :  { %1777 = vmatpush1.bf16.msra.mxu0 %v2340_v32 }
 0x46d   :  { %1779 = vmatprep.subr.bf16.mxu0 %v2344_v33 }
 0x470   :  { %1781 = vmatpush1.bf16.msra.mxu0 %v2351_v38 }
 0x471   :  { %1799 = vmatprep.subr.bf16.mxu0 %v2317_v11 }
 0x536   :  { %v650_v6 = vpop.f32.mrb[8].mxu0 }
 0x537   :  { %v655_v7 = vadd.f32 %v650_v6, %v580_v16  ;;  %v652_v20 = vpop.f32.mrb[9].mxu0 }
 0x538   :  { %v656_v30 = vadd.f32 %v652_v20, %v581_v23 }
 0x539   :  { %v1600_v31 = vmul.f32 -1.442695, %v655_v7 }
 0x53a   :  { %v1601_v48 = vmul.f32 -1.442695, %v656_v30 }
 0x53b   :  { %1895 = vpow2.f32 %v1600_v31 }
 0x53c   :  { %1897 = vtanh.f32 %v656_v30 }
 0x545   :  { %v1896_v36 = vpop.eup %1895 }
 0x546   :  { %v663_v41 = vadd.f32 1.0, %v1896_v36  ;;  %v1898_v42 = vpop.eup %1897 }
 0x548   :  { %1899 = vrcp.f32 %v663_v41 }
 0x549   :  { %1901 = vpow2.f32 %v1601_v48 }
 0x552   :  { %v1900_v46 = vpop.eup %1899 }
 0x553   :  { %v671_v47 = vmul.f32 %v1900_v46, %v1898_v42  ;;  %v1902_v16 = vpop.eup %1901  ;;  %v670_v51 = vmul.f32 %v1900_v46, %v560_v60 }
 0x554   :  { %v664_v50 = vadd.f32 1.0, %v1902_v16 }
 0x555   :  { %673 = vrot.lane.b32.xlu0 %v671_v47, %s2165_s6 }
 0x556   :  { %1903 = vrcp.f32 %v664_v50 }
 0x560   :  { %v1904_v23 = vpop.eup %1903 }
 0x5c7   :  { %v674_v52 = vpop.permute.xlu0 %673 }
 0x5c8   :  { %v676_v54 = vadd.f32 %v674_v52, %v670_v51 }
 0x5ca   :  { %1905 = vtanh.f32 %v676_v54 }
 0x5d4   :  { %v1906_v15 = vpop.eup %1905 }
 0x5d5   :  { %v2534_v55 = vmul.f32 %v1906_v15, %v1904_v23 }
 0x5d7   :  { %680 = vrot.lane.b32.xlu1 %v2534_v55, %s2165_s6 }
 0x649   :  { %v681_v56 = vpop.permute.xlu1 %680 }
 0x64a   :  { %684 = vst.msk [vmem:[#allocation3 + $0x10] sm:$0xff] %vm451_vm3, %v681_v56  ;;  %1602 = vmatmul.mubr.msk.f32.vlgmr.msra.gmra.mrb[12].mxu1 %vm348_vm4, %v681_v56 }
 0x64b   :  { %1785 = vmatpush1.bf16.msra.mxu1 %v2319_v14  ;;  %992 = vmatprep.mubr.f32.mxu1 %v2164_v0 }
 0x64c   :  { %1787 = vmatprep.subr.bf16.mxu1 %v2322_v17 }
 0x64f   :  { %1789 = vmatpush1.bf16.msra.mxu1 %v2329_v24 }
 0x650   :  { %1791 = vmatprep.subr.bf16.mxu1 %v2333_v25 }
 0x653   :  { %1793 = vmatpush1.bf16.msra.mxu1 %v2340_v32 }
 0x654   :  { %1795 = vmatprep.subr.bf16.mxu1 %v2344_v33 }
 0x657   :  { %1797 = vmatpush1.bf16.msra.mxu1 %v2351_v38 }
 0x658   :  { %1815 = vmatprep.subr.bf16.mxu1 %v2317_v11 }
 0x71d   :  { %v766_v58 = vpop.f32.mrb[12].mxu1 }
 0x71e   :  { %v771_v60 = vadd.f32 %v766_v58, %v696_v37  ;;  %v768_v22 = vpop.f32.mrb[13].mxu1 }
 0x71f   :  { %v772_v61 = vadd.f32 %v768_v22, %v697_v43 }
 0x720   :  { %v1603_v2 = vmul.f32 -1.442695, %v771_v60 }
 0x721   :  { %v1604_v31 = vmul.f32 -1.442695, %v772_v61 }
 0x722   :  { %1907 = vpow2.f32 %v1603_v2 }
 0x723   :  { %1909 = vtanh.f32 %v772_v61 }
 0x72c   :  { %v1908_v6 = vpop.eup %1907 }
 0x72d   :  { %v779_v7 = vadd.f32 1.0, %v1908_v6  ;;  %v1910_v11 = vpop.eup %1909 }
 0x72f   :  { %1911 = vrcp.f32 %v779_v7 }
 0x730   :  { %1913 = vpow2.f32 %v1604_v31 }
 0x739   :  { %v1912_v20 = vpop.eup %1911 }
 0x73a   :  { %v787_v30 = vmul.f32 %v1912_v20, %v1910_v11  ;;  %v1914_v37 = vpop.eup %1913  ;;  %v786_v41 = vmul.f32 %v1912_v20, %v676_v54 }
 0x73b   :  { %v780_v36 = vadd.f32 1.0, %v1914_v37 }
 0x73c   :  { %789 = vrot.lane.b32.xlu0 %v787_v30, %s2165_s6 }
 0x73d   :  { %1915 = vrcp.f32 %v780_v36 }
 0x747   :  { %v1916_v43 = vpop.eup %1915 }
 0x7ae   :  { %v790_v42 = vpop.permute.xlu0 %789 }
 0x7af   :  { %v792_v46 = vadd.f32 %v790_v42, %v786_v41 }
 0x7b1   :  { %1917 = vtanh.f32 %v792_v46 }
 0x7bb   :  { %v1918_v47 = vpop.eup %1917 }
 0x7bc   :  { %v2560_v48 = vmul.f32 %v1918_v47, %v1916_v43 }
 0x7be   :  { %796 = vrot.lane.b32.xlu1 %v2560_v48, %s2165_s6 }
 0x830   :  { %v797_v16 = vpop.permute.xlu1 %796 }
 0x831   :  { %800 = vst.msk [vmem:[#allocation3 + $0x18] sm:$0xff] %vm451_vm3, %v797_v16  ;;  %1605 = vmatmul.mubr.msk.f32.vlgmr.msra.gmra.mrb[10].mxu0 %vm348_vm4, %v797_v16 }
 0x832   :  { %1801 = vmatpush1.bf16.msra.mxu0 %v2319_v14  ;;  %1106 = vmatprep.mubr.f32.mxu0 %v2164_v0 }
 0x833   :  { %1803 = vmatprep.subr.bf16.mxu0 %v2322_v17 }
 0x836   :  { %1805 = vmatpush1.bf16.msra.mxu0 %v2329_v24 }
 0x837   :  { %1807 = vmatprep.subr.bf16.mxu0 %v2333_v25 }
 0x83a   :  { %1809 = vmatpush1.bf16.msra.mxu0 %v2340_v32 }
 0x83b   :  { %1811 = vmatprep.subr.bf16.mxu0 %v2344_v33 }
 0x83e   :  { %1813 = vmatpush1.bf16.msra.mxu0 %v2351_v38 }
 0x904   :  { %v880_v50 = vpop.f32.mrb[10].mxu0 }
 0x905   :  { %v885_v51 = vadd.f32 %v880_v50, %v810_v39  ;;  %v882_v52 = vpop.f32.mrb[11].mxu0 }
 0x906   :  { %v886_v54 = vadd.f32 %v882_v52, %v811_v44 }
 0x907   :  { %v1606_v23 = vmul.f32 -1.442695, %v885_v51 }
 0x908   :  { %v1607_v49 = vmul.f32 -1.442695, %v886_v54 }
 0x909   :  { %1919 = vpow2.f32 %v1606_v23 }
 0x90a   :  { %1921 = vtanh.f32 %v886_v54 }
 0x913   :  { %v1920_v15 = vpop.eup %1919 }
 0x914   :  { %v893_v56 = vadd.f32 1.0, %v1920_v15  ;;  %v1922_v58 = vpop.eup %1921 }
 0x916   :  { %1923 = vrcp.f32 %v893_v56 }
 0x917   :  { %1925 = vpow2.f32 %v1607_v49 }
 0x920   :  { %v1924_v60 = vpop.eup %1923 }
 0x921   :  { %v901_v22 = vmul.f32 %v1924_v60, %v1922_v58  ;;  %v1926_v28 = vpop.eup %1925  ;;  %v900_v61 = vmul.f32 %v1924_v60, %v792_v46 }
 0x922   :  { %v894_v39 = vadd.f32 1.0, %v1926_v28 }
 0x923   :  { %903 = vrot.lane.b32.xlu0 %v901_v22, %s2165_s6 }
 0x924   :  { %1927 = vrcp.f32 %v894_v39 }
 0x92e   :  { %v1928_v53 = vpop.eup %1927 }
 0x995   :  { %v904_v2 = vpop.permute.xlu0 %903 }
 0x996   :  { %v906_v6 = vadd.f32 %v904_v2, %v900_v61 }
 0x998   :  { %1929 = vtanh.f32 %v906_v6 }
 0x9a2   :  { %v1930_v34 = vpop.eup %1929 }
 0x9a3   :  { %v2585_v44 = vmul.f32 %v1930_v34, %v1928_v53  ;;  %v1282_v34 = vld [vmem:[#allocation14 + $0x8] sm:$0xff] }
 0x9a5   :  { %910 = vrot.lane.b32.xlu1 %v2585_v44, %s2165_s6 }
 0xa17   :  { %v911_v7 = vpop.permute.xlu1 %910 }
 0xa18   :  { %914 = vst.msk [vmem:[#allocation3 + $0x20] sm:$0xff] %vm451_vm3, %v911_v7  ;;  %1608 = vmatmul.mubr.msk.f32.vlgmr.msra.gmra.mrb[14].mxu1 %vm348_vm4, %v911_v7 }
 0xa19   :  { %1817 = vmatpush1.bf16.msra.mxu1 %v2319_v14  ;;  %1220 = vmatprep.mubr.f32.mxu1 %v2164_v0 }
 0xa1a   :  { %1819 = vmatprep.subr.bf16.mxu1 %v2322_v17 }
 0xa1d   :  { %1821 = vmatpush1.bf16.msra.mxu1 %v2329_v24 }
 0xa1e   :  { %1823 = vmatprep.subr.bf16.mxu1 %v2333_v25 }
 0xa21   :  { %1825 = vmatpush1.bf16.msra.mxu1 %v2340_v32 }
 0xa22   :  { %1827 = vmatprep.subr.bf16.mxu1 %v2344_v33 }
 0xa25   :  { %1829 = vmatpush1.bf16.msra.mxu1 %v2351_v38 }
 0xaeb   :  { %v994_v11 = vpop.f32.mrb[14].mxu1 }
 0xaec   :  { %v999_v14 = vadd.f32 %v994_v11, %v924_v18  ;;  %v996_v0 = vpop.f32.mrb[15].mxu1 }
 0xaed   :  { %v1000_v17 = vadd.f32 %v996_v0, %v925_v26 }
 0xaee   :  { %v1609_v24 = vmul.f32 -1.442695, %v999_v14 }
 0xaef   :  { %v1610_v57 = vmul.f32 -1.442695, %v1000_v17 }
 0xaf0   :  { %1931 = vpow2.f32 %v1609_v24  ;;  %v1277_v24 = vld [vmem:[#allocation13] sm:$0xff] }
 0xaf1   :  { %1933 = vtanh.f32 %v1000_v17 }
 0xafa   :  { %v1932_v25 = vpop.eup %1931 }
 0xafb   :  { %v1007_v32 = vadd.f32 1.0, %v1932_v25  ;;  %v1934_v33 = vpop.eup %1933  ;;  %v1278_v25 = vld [vmem:[#allocation13 + $0x8] sm:$0xff] }
 0xafd   :  { %1935 = vrcp.f32 %v1007_v32 }
 0xafe   :  { %1937 = vpow2.f32 %v1610_v57 }
 0xb07   :  { %v1936_v38 = vpop.eup %1935 }
 0xb08   :  { %v1015_v20 = vmul.f32 %v1936_v38, %v1934_v33  ;;  %v1938_v4 = vpop.eup %1937  ;;  %v1014_v30 = vmul.f32 %v1936_v38, %v906_v6  ;;  %v1838_v33 = vpack.c.bf16 %v1278_v25, %v1277_v24 }
 0xb09   :  { %v1008_v18 = vadd.f32 1.0, %v1938_v4 }
 0xb0a   :  { %1017 = vrot.lane.b32.xlu0 %v1015_v20, %s2165_s6 }
 0xb0b   :  { %1939 = vrcp.f32 %v1008_v18  ;;  %v1279_v18 = vld [vmem:[#allocation13 + $0x10] sm:$0xff] }
 0xb15   :  { %v1940_v62 = vpop.eup %1939 }
 0xb7c   :  { %v1018_v31 = vpop.permute.xlu0 %1017 }
 0xb7d   :  { %v1020_v37 = vadd.f32 %v1018_v31, %v1014_v30  ;;  %v1280_v30 = vld [vmem:[#allocation13 + $0x18] sm:$0xff] }
 0xb7f   :  { %1941 = vtanh.f32 %v1020_v37 }
 0xb89   :  { %v1942_v12 = vpop.eup %1941 }
 0xb8a   :  { %v2610_v26 = vmul.f32 %v1942_v12, %v1940_v62  ;;  %v1842_v62 = vpack.c.bf16 %v1280_v30, %v1279_v18 }
 0xb8c   :  { %1024 = vrot.lane.b32.xlu1 %v2610_v26, %s2165_s6 }
 0xbfe   :  { %v1025_v36 = vpop.permute.xlu1 %1024 }
 0xbff   :  { %1028 = vst.msk [vmem:[#allocation3 + $0x28] sm:$0xff] %vm451_vm3, %v1025_v36  ;;  %1611 = vmatmul.mubr.msk.f32.vlgmr.msra.gmra.mrb[12].mxu0 %vm348_vm4, %v1025_v36 }
 0xcd2   :  { %v1108_v41 = vpop.f32.mrb[12].mxu0 }
 0xcd3   :  { %v1113_v42 = vadd.f32 %v1108_v41, %v1038_v19  ;;  %v1110_v46 = vpop.f32.mrb[13].mxu0 }
 0xcd4   :  { %v1114_v43 = vadd.f32 %v1110_v46, %v1039_v27 }
 0xcd5   :  { %v1612_v47 = vmul.f32 -1.442695, %v1113_v42 }
 0xcd6   :  { %v1613_v59 = vmul.f32 -1.442695, %v1114_v43 }
 0xcd7   :  { %1943 = vpow2.f32 %v1612_v47  ;;  %v1261_v47 = vld [vmem:[#allocation3] sm:$0xff] }
 0xcd8   :  { %1945 = vtanh.f32 %v1114_v43 }
 0xce1   :  { %v1944_v16 = vpop.eup %1943 }
 0xce2   :  { %v1121_v50 = vadd.f32 1.0, %v1944_v16  ;;  %v1946_v51 = vpop.eup %1945  ;;  %v1262_v16 = vld [vmem:[#allocation3 + $0x8] sm:$0xff] }
 0xce4   :  { %1947 = vrcp.f32 %v1121_v50  ;;  %v1263_v50 = vld [vmem:[#allocation3 + $0x10] sm:$0xff] }
 0xce5   :  { %1949 = vpow2.f32 %v1613_v59 }
 0xcee   :  { %v1948_v52 = vpop.eup %1947 }
 0xcef   :  { %v1129_v54 = vmul.f32 %v1948_v52, %v1946_v51  ;;  %v1950_v5 = vpop.eup %1949  ;;  %v1128_v23 = vmul.f32 %v1948_v52, %v1020_v37  ;;  %v1264_v51 = vld [vmem:[#allocation3 + $0x18] sm:$0xff]  ;;  %v1265_v52 = vld [vmem:[#allocation3 + $0x20] sm:$0xff] }
 0xcf0   :  { %v1122_v19 = vadd.f32 1.0, %v1950_v5 }
 0xcf1   :  { %1131 = vrot.lane.b32.xlu0 %v1129_v54, %s2165_s6  ;;  %v1266_v54 = vld [vmem:[#allocation3 + $0x28] sm:$0xff] }
 0xcf2   :  { %1951 = vrcp.f32 %v1122_v19  ;;  %v1633_v19 = vld [vmem:[#allocation16] ss:$0 sm:$0xff] }
 0xcfc   :  { %v1952_v63 = vpop.eup %1951 }
 0xd63   :  { %v1132_v15 = vpop.permute.xlu0 %1131 }
 0xd64   :  { %v1134_v56 = vadd.f32 %v1132_v15, %v1128_v23 }
 0xd66   :  { %1953 = vtanh.f32 %v1134_v56 }
 0xd70   :  { %v1954_v13 = vpop.eup %1953 }
 0xd71   :  { %v1136_v27 = vmul.f32 %v1954_v13, %v1952_v63 }
 0xd73   :  { %1138 = vrot.lane.b32.xlu1 %v1136_v27, %s2165_s6 }
 0xde5   :  { %v1139_v58 = vpop.permute.xlu1 %1138 }
 0xde6   :  { %1142 = vst.msk [vmem:[#allocation3 + $0x30] sm:$0xff] %vm451_vm3, %v1139_v58  ;;  %1614 = vmatmul.mubr.msk.f32.vlgmr.msra.gmra.mrb[16].mxu1 %vm348_vm4, %v1139_v58 }
 0xded   :  { %v1267_v59 = vld [vmem:[#allocation3 + $0x30] sm:$0xff] }
 0xeb9   :  { %v1222_v60 = vpop.f32.mrb[16].mxu1 }
 0xeba   :  { %v1227_v22 = vadd.f32 %v1222_v60, %v1152_v40  ;;  %v1224_v49 = vpop.f32.mrb[17].mxu1 }
 0xebb   :  { %v1228_v28 = vadd.f32 %v1224_v49, %v1153_v45  ;;  %v1281_v45 = vld [vmem:[#allocation14] sm:$0xff] }
 0xebc   :  { %v1615_v39 = vmul.f32 -1.442695, %v1227_v22  ;;  %v1830_v7 = vpack.c.bf16 %v1282_v34, %v1281_v45 }
 0xebd   :  { %v1616_v8 = vmul.f32 -1.442695, %v1228_v28 }
 0xebe   :  { %1955 = vpow2.f32 %v1615_v39  ;;  %1831 = vmatprep.subr.bf16.mxu0 %v1830_v7 }
 0xebf   :  { %1957 = vtanh.f32 %v1228_v28  ;;  %1833 = vmatpush3.bf16.msra.mxu0 %v1830_v7 }
 0xec8   :  { %v1956_v61 = vpop.eup %1955 }
 0xec9   :  { %v1235_v2 = vadd.f32 1.0, %v1956_v61  ;;  %v1958_v6 = vpop.eup %1957 }
 0xecb   :  { %1959 = vrcp.f32 %v1235_v2 }
 0xecc   :  { %1961 = vpow2.f32 %v1616_v8 }
 0xed5   :  { %v1960_v53 = vpop.eup %1959 }
 0xed6   :  { %v1243_v3 = vmul.f32 %v1960_v53, %v1958_v6  ;;  %v1962_v9 = vpop.eup %1961  ;;  %v1242_v29 = vmul.f32 %v1960_v53, %v1134_v56 }
 0xed7   :  { %v1236_v10 = vadd.f32 1.0, %v1962_v9 }
 0xed8   :  { %1245 = vrot.lane.b32.xlu0 %v1243_v3, %s2165_s6 }
 0xed9   :  { %1963 = vrcp.f32 %v1236_v10 }
 0xedc   :  { %1143 = vrot.lane.b32.xlu0 %v1136_v27, %s2166_s3 }
 0xee0   :  { %915 = vrot.lane.b32.xlu0 %v2585_v44, %s2166_s3  ;;  %v1284_v44 = vld [vmem:[#allocation14 + $0x18] sm:$0xff] }
 0xee3   :  { %v1964_v0 = vpop.eup %1963 }
 0xee4   :  { %685 = vrot.lane.b32.xlu0 %v2534_v55, %s2166_s3  ;;  %v1283_v55 = vld [vmem:[#allocation14 + $0x10] sm:$0xff] }
 0xee8   :  { %453 = vrot.lane.b32.xlu0 %v2482_v21, %s2166_s3  ;;  %v1834_v21 = vpack.c.bf16 %v1284_v44, %v1283_v55 }
 0xeea   :  { %1835 = vmatprep.subr.bf16.mxu0 %v1834_v21 }
 0xeeb   :  { %1837 = vmatpush3.bf16.msra.mxu0 %v1834_v21 }
 0xeec   :  { %1839 = vmatprep.subr.bf16.mxu0 %v1838_v33 }
 0xf4a   :  { %v1246_v35 = vpop.permute.xlu0 %1245 }
 0xf4b   :  { %v1248_v40 = vadd.f32 %v1246_v35, %v1242_v29 }
 0xf4d   :  { %1965 = vtanh.f32 %v1248_v40 }
 0xf4e   :  { %v1144_v11 = vpop.permute.xlu0 %1143 }
 0xf4f   :  { %1147 = vst.msk [vmem:[#allocation4 + $0x8] sm:$0xff] %vm451_vm3, %v1144_v11 }
 0xf52   :  { %v916_v14 = vpop.permute.xlu0 %915 }
 0xf53   :  { %919 = vst.msk [vmem:[#allocation4 + $0x18] sm:$0xff] %vm451_vm3, %v916_v14 }
 0xf56   :  { %v686_v17 = vpop.permute.xlu0 %685 }
 0xf57   :  { %v1966_v32 = vpop.eup %1965  ;;  %689 = vst.msk [vmem:[#allocation4 + $0x28] sm:$0xff] %vm451_vm3, %v686_v17 }
 0xf58   :  { %v1250_v38 = vmul.f32 %v1966_v32, %v1964_v0 }
 0xf5a   :  { %v454_v20 = vpop.permute.xlu0 %453  ;;  %1257 = vrot.lane.b32.xlu1 %v1250_v38, %s2166_s3 }
 0xf5b   :  { %457 = vst.msk [vmem:[#allocation4 + $0x38] sm:$0xff] %vm451_vm3, %v454_v20 }
 0xf5e   :  { %1029 = vrot.lane.b32.xlu1 %v2610_v26, %s2166_s3  ;;  %v1272_v26 = vld [vmem:[#allocation4 + $0x18] sm:$0xff]  ;;  %v1274_v42 = vld [vmem:[#allocation4 + $0x28] sm:$0xff] }
 0xf62   :  { %801 = vrot.lane.b32.xlu1 %v2560_v48, %s2166_s3  ;;  %v1270_v48 = vld [vmem:[#allocation4 + $0x8] sm:$0xff]  ;;  %v1276_v43 = vld [vmem:[#allocation4 + $0x38] sm:$0xff] }
 0xf66   :  { %569 = vrot.lane.b32.xlu1 %v2508_v1, %s2166_s3 }
 0xf6a   :  { %1252 = vrot.lane.b32.xlu1 %v1250_v38, %s2165_s6 }
 0xfcc   :  { %v1258_v57 = vpop.permute.xlu1 %1257 }
 0xfcd   :  { %1260 = vst.msk [vmem:[#allocation4] sm:$0xff] %vm451_vm3, %v1258_v57 }
 0xfd0   :  { %v1030_v4 = vpop.permute.xlu1 %1029 }
 0xfd1   :  { %1033 = vst.msk [vmem:[#allocation4 + $0x10] sm:$0xff] %vm451_vm3, %v1030_v4 }
 0xfd4   :  { %v802_v31 = vpop.permute.xlu1 %801  ;;  %v1269_v37 = vld [vmem:[#allocation4] sm:$0xff] }
 0xfd5   :  { %805 = vst.msk [vmem:[#allocation4 + $0x20] sm:$0xff] %vm451_vm3, %v802_v31  ;;  %1666 = vmatprep.mubr.msk.f32.mxu0 %vm451_vm3, %v1269_v37 }
 0xfd6   :  { %1667 = vmatmul.mubr.msk.f32.vlgmr.msra.gmra.mrb[14].mxu0 %vm451_vm3, %v1270_v48 }
 0xfd7   :  { %1841 = vmatpush3.bf16.msra.mxu0 %v1838_v33 }
 0xfd8   :  { %v570_v1 = vpop.permute.xlu1 %569  ;;  %v1271_v12 = vld [vmem:[#allocation4 + $0x10] sm:$0xff]  ;;  %1843 = vmatprep.subr.bf16.mxu0 %v1842_v62 }
 0xfd9   :  { %573 = vst.msk [vmem:[#allocation4 + $0x30] sm:$0xff] %vm451_vm3, %v570_v1  ;;  %1669 = vmatprep.mubr.msk.f32.mxu0 %vm451_vm3, %v1271_v12 }
 0xfda   :  { %1670 = vmatmul.mubr.msk.f32.gmra.mrb[16].mxu0 %vm451_vm3, %v1272_v26 }
 0xfdb   :  { %1845 = vmatpush3.bf16.msra.mxu0 %v1842_v62 }
 0xfdc   :  { %v1253_v36 = vpop.permute.xlu1 %1252  ;;  %v1273_v41 = vld [vmem:[#allocation4 + $0x20] sm:$0xff] }
 0xfdd   :  { %1256 = vst.msk [vmem:[#allocation3 + $0x38] sm:$0xff] %vm451_vm3, %v1253_v36  ;;  %1672 = vmatprep.mubr.msk.f32.mxu0 %vm451_vm3, %v1273_v41 }
 0xfde   :  { %1673 = vmatmul.mubr.msk.f32.gmra.mrb[18].mxu0 %vm451_vm3, %v1274_v42 }
 0xfe0   :  { %v1275_v46 = vld [vmem:[#allocation4 + $0x30] sm:$0xff] }
 0xfe1   :  { %1675 = vmatprep.mubr.msk.f32.mxu0 %vm451_vm3, %v1275_v46 }
 0xfe2   :  { %1676 = vmatmul.mubr.msk.f32.gmra.mrb[20].mxu0 %vm451_vm3, %v1276_v43 }
 0xfe3   :  { %1686 = vmatprep.mubr.msk.f32.mxu0 %vm451_vm3, %v1261_v47 }
 0xfe4   :  { %v1268_v5 = vld [vmem:[#allocation3 + $0x38] sm:$0xff] }
 0xfe6   :  { %1687 = vmatmul.mubr.msk.f32.vlgmr.msra.gmra.mrb[14].mxu0 %vm451_vm3, %v1262_v16 }
 0xfe7   :  { %1689 = vmatprep.mubr.msk.f32.mxu0 %vm451_vm3, %v1263_v50 }
 0xfea   :  { %1690 = vmatmul.mubr.msk.f32.gmra.mrb[16].mxu0 %vm451_vm3, %v1264_v51 }
 0xfeb   :  { %1692 = vmatprep.mubr.msk.f32.mxu0 %vm451_vm3, %v1265_v52 }
 0xfee   :  { %1693 = vmatmul.mubr.msk.f32.gmra.mrb[18].mxu0 %vm451_vm3, %v1266_v54 }
 0xfef   :  { %1695 = vmatprep.mubr.msk.f32.mxu0 %vm451_vm3, %v1267_v59 }
 0xff2   :  { %1696 = vmatmul.mubr.msk.f32.gmra.mrb[20].mxu0 %vm451_vm3, %v1268_v5 }
0x10b9   :  { %v1688_v23 = vpop.f32.mrb[14].mxu0 }
0x10ba   :  { %v1551_v15 = vadd.f32 %v1688_v23, %v1633_v19  ;;  %v1504_v56 = vpop.f32.mrb[15].mxu0 }
0x10bb   :  { %v1550_v63 = vadd.f32 %v1633_v19, %v1504_v56 }
0x10bc   :  { %1559 = vst [vmem:[#allocation17 + $0x8] sm:$0xff] %v1551_v15 }
0x10bd   :  { %1558 = vst [vmem:[#allocation17] sm:$0xff] %v1550_v63  ;;  %v1691_v13 = vpop.f32.mrb[16].mxu0 }
0x10be   :  { %v1553_v27 = vadd.f32 %v1691_v13, %v1633_v19  ;;  %v1514_v58 = vpop.f32.mrb[17].mxu0 }
0x10bf   :  { %v1552_v60 = vadd.f32 %v1633_v19, %v1514_v58 }
0x10c0   :  { %1561 = vst [vmem:[#allocation17 + $0x18] sm:$0xff] %v1553_v27 }
0x10c1   :  { %1560 = vst [vmem:[#allocation17 + $0x10] sm:$0xff] %v1552_v60  ;;  %v1694_v22 = vpop.f32.mrb[18].mxu0 }
0x10c2   :  { %v1555_v49 = vadd.f32 %v1694_v22, %v1633_v19  ;;  %v1524_v28 = vpop.f32.mrb[19].mxu0 }
0x10c3   :  { %v1554_v39 = vadd.f32 %v1633_v19, %v1524_v28 }
0x10c4   :  { %1563 = vst [vmem:[#allocation17 + $0x28] sm:$0xff] %v1555_v49 }
0x10c5   :  { %1562 = vst [vmem:[#allocation17 + $0x20] sm:$0xff] %v1554_v39  ;;  %v1697_v61 = vpop.f32.mrb[20].mxu0 }
0x10c6   :  { %v1557_v2 = vadd.f32 %v1697_v61, %v1633_v19  ;;  %v1534_v6 = vpop.f32.mrb[21].mxu0 }
0x10c7   :  { %v1556_v53 = vadd.f32 %v1633_v19, %v1534_v6 }
0x10c8   :  { %1565 = vst [vmem:[#allocation17 + $0x38] sm:$0xff] %v1557_v2 }
0x10c9   :  { %1564 = vst [vmem:[#allocation17 + $0x30] sm:$0xff] %v1556_v53 }
0x10ca   :  { %2132 = shalt.err (!%p2129_p4)
}
0x10cb   :  { %s2133_s19 = scalar_lea.hbm %s2703_s7, 1024 }
0x10cc   :  { %p2134_p5 = scmp.ne.s32.totalorder %s2703_s7, %s2133_s19  ;;  %p2137_p6 = scmp.lt.u32.totalorder %s2133_s19, %s2703_s7 }
0x10ce   :  { %p2139_p7 = pnand %p2137_p6, %p2134_p5 }
0x10d0   :  { %2142 = shalt.err (!%p2139_p7)
}
0x10d1   :  { %1577 = dma.vmem_to_hbm [thread:$0]  %s1572_s29, 1024, %s2703_s7, [#allocation7], %s2159_s11, %s2159_s11, %s2160_s12  }
0x10d2   :  { %2151 = dma.done.wait [#allocation7], 1024  }
0x10d3   :  { %2152 = vsyncadd [#allocation7], 4294966272 }
0x10d4   :  { %1581 = vsyncpa [#allocation6], 1 }
0x10d5   :  { %1582 = vsyncpa [#allocation9], 1 }
0x10d6   :  { %1583 = vsyncpa [#allocation12], 1 }
0x10d7   :  { %1584 = vsyncpa [#allocation15], 1 }
0x10d8   :  { %1585 = vsyncpa [#allocation7], 1 }

</bundles_post_ra>
